<compile_context>
chip_gen: v7x
topology: tpu7x:2x2x1
jax: 0.10.0
libtpu: 0.0.40
codegen_flags: <defaults>
</compile_context>

<pallas_src>
import jax
import jax.numpy as jnp
import numpy as np
from jax import lax
from jax.experimental import pallas as pl
from jax.experimental.pallas import tpu as pltpu

_MARGIN = 8  # guard rows on each end of a phase slab (absorb +-1 tap overhang)


# ------------------------------- kernel ---------------------------------------
def _make_kernel(*, s, Wo, tile_h, phases, top_phases, bot_phases, has_sc_conv):
    P = len(phases)
    tile_flat = tile_h * Wo
    off_top = _MARGIN
    off_center = _MARGIN + Wo
    off_bot = _MARGIN + Wo + tile_flat
    phase_index = {p: i for i, p in enumerate(phases)}
    n_top, n_bot = len(top_phases), len(bot_phases)

    def kernel(*refs):
        i = 0
        xc = refs[i:i + P]; i += P
        xt = dict(zip(top_phases, refs[i:i + n_top])); i += n_top
        xb = dict(zip(bot_phases, refs[i:i + n_bot])); i += n_bot
        w1_ref, b1_ref, w2_ref, b2_ref, w3_ref, b3_ref = refs[i:i + 6]; i += 6
        if has_sc_conv:
            ws_ref, bs_ref = refs[i:i + 2]; i += 2
        out_ref = refs[i]; i += 1
        slabs = refs[i:i + P]

        t = pl.program_id(1)
        n_t = pl.num_programs(1)

        w1 = w1_ref[...]            # (Cin, C) bf16
        b1 = b1_ref[...]            # (1, C)  f32

        def conv1(x_bf16):
            y = jnp.dot(x_bf16, w1, preferred_element_type=jnp.float32) + b1
            return jnp.maximum(y, 0.0)

        # --- conv1 + BN + ReLU per phase, staged into the slab scratch (bf16) ---
        for pi in range(P):
            slabs[pi][off_center:off_center + tile_flat, :] = (
                conv1(xc[pi][0]).astype(jnp.bfloat16))
            if pi in xt:
                y1t = conv1(xt[pi][0])
                y1t = y1t * (t > 0).astype(jnp.float32)        # image top border
                slabs[pi][off_top:off_top + Wo, :] = y1t.astype(jnp.bfloat16)
            if pi in xb:
                y1b = conv1(xb[pi][0])
                y1b = y1b * (t < n_t - 1).astype(jnp.float32)  # image bottom border
                slabs[pi][off_bot:off_bot + Wo, :] = y1b.astype(jnp.bfloat16)

        # --- column-validity masks, generated once (hoisted broadcast) ----------
        c_mid = w2_ref.shape[3]
        col = lax.broadcasted_iota(jnp.int32, (tile_flat, c_mid), 0) % Wo
        mask_l = col >= 1
        mask_r = col <= Wo - 2

        # --- conv2 (3x3, stride folded into phase decomposition): 9 matmuls ------
        # Accumulator starts at the folded BN bias (saves a tile-wide add).
        acc = jnp.broadcast_to(b2_ref[...], (tile_flat, c_mid)).astype(jnp.float32)
        for kh in range(3):
            for kw in range(3):
                dh, dw = kh - 1, kw - 1
                pi = phase_index[(dh % s, dw % s)]
                Dh, Dw = dh // s, dw // s
                start = off_center + Dh * Wo + Dw
                tap = slabs[pi][start:start + tile_flat, :]
                if Dw == -1:
                    tap = jnp.where(mask_l, tap, jnp.zeros_like(tap))
                elif Dw == 1:
                    tap = jnp.where(mask_r, tap, jnp.zeros_like(tap))
                acc = acc + jnp.dot(tap, w2_ref[kh, kw],
                                    preferred_element_type=jnp.float32)
        y2 = jnp.maximum(acc, 0.0)

        # --- conv3 + BN -----------------------------------------------------------
        y3 = jnp.dot(y2.astype(jnp.bfloat16), w3_ref[...],
                     preferred_element_type=jnp.float32) + b3_ref[...]

        # --- shortcut (phase (0,0) of x is exactly the strided sampling of x) ----
        x00 = xc[phase_index[(0, 0)]][0]
        if has_sc_conv:
            res = jnp.dot(x00, ws_ref[...],
                          preferred_element_type=jnp.float32) + bs_ref[...]
        else:
            res = x00.astype(jnp.float32)

        # --- add + ReLU -----------------------------------------------------------
        out_ref[0] = jnp.maximum(y3 + res, 0.0)

    return kernel


# ------------------------------- wrapper ---------------------------------------
def _fold_bn(gamma, beta, mean, var, eps):
    scale = gamma / jnp.sqrt(var + eps)
    bias = beta - mean * scale
    return scale, bias


def _pick_tile_h(Ho, Wo, max_rows):
    divs = [d for d in range(1, Ho + 1) if Ho % d == 0]
    ok = [d for d in divs if (d * Wo) % 8 == 0 or d == Ho]
    if not ok:
        return Ho
    fitting = [d for d in ok if d * Wo <= max_rows]
    return max(fitting) if fitting else min(ok)


def bottleneck_forward(x_nchw, params, stride=1, eps=1e-5, max_tile_rows=512):
    B, Cin, H, W = x_nchw.shape
    C = params["w1"].shape[0]
    C4 = params["w3"].shape[0]
    s = int(stride)
    assert H % s == 0 and W % s == 0, "spatial dims must be divisible by stride"
    Ho, Wo = H // s, W // s
    has_sc_conv = (s != 1) or (Cin != C4)

    # ---- fold BN scale into conv weights, cast matmul operands to bf16 ----------
    s1, b1 = _fold_bn(*params["bn1"], eps)
    s2, b2 = _fold_bn(*params["bn2"], eps)
    s3, b3 = _fold_bn(*params["bn3"], eps)
    w1 = (params["w1"][:, :, 0, 0] * s1[:, None]).T.astype(jnp.bfloat16)        # (Cin, C)
    w2 = (jnp.transpose(params["w2"], (2, 3, 1, 0))
          * s2[None, None, None, :]).astype(jnp.bfloat16)                        # (3,3,C,C)
    w3 = (params["w3"][:, :, 0, 0] * s3[:, None]).T.astype(jnp.bfloat16)         # (C, C4)
    b1 = b1[None, :].astype(jnp.float32)
    b2 = b2[None, :].astype(jnp.float32)
    b3 = b3[None, :].astype(jnp.float32)

    # ---- activations: NCHW -> NHWC, stride phase decomposition, flatten, bf16 ---
    x_nhwc = jnp.transpose(x_nchw, (0, 2, 3, 1))
    phases = [(pr, pc) for pr in range(s) for pc in range(s)]
    x_ph = [x_nhwc[:, pr::s, pc::s, :].reshape(B, Ho * Wo, Cin).astype(jnp.bfloat16)
            for (pr, pc) in phases]

    # which phases feed dh = -1 / +1 taps (need a one-slab-row halo)
    needs_top = {p: False for p in phases}
    needs_bot = {p: False for p in phases}
    for dh in (-1, 0, 1):
        for dw in (-1, 0, 1):
            p = (dh % s, dw % s)
            if dh // s == -1:
                needs_top[p] = True
            if dh // s == 1:
                needs_bot[p] = True
    top_phases = [i for i, p in enumerate(phases) if needs_top[p]]
    bot_phases = [i for i, p in enumerate(phases) if needs_bot[p]]

    tile_h = _pick_tile_h(Ho, Wo, max_tile_rows)
    tile_flat = tile_h * Wo
    n_tiles = Ho // tile_h

    # ---- BlockSpecs --------------------------------------------------------------
    def full_spec(a):
        nd = a.ndim
        return pl.BlockSpec(a.shape, lambda b, t, nd=nd: (0,) * nd)

    center_spec = pl.BlockSpec((1, tile_flat, Cin), lambda b, t: (b, t, 0))
    top_spec = pl.BlockSpec(
        (1, Wo, Cin), lambda b, t: (b, jnp.maximum(t * tile_h - 1, 0), 0))
    bot_spec = pl.BlockSpec(
        (1, Wo, Cin), lambda b, t: (b, jnp.minimum(t * tile_h + tile_h, Ho - 1), 0))

    inputs = list(x_ph)
    in_specs = [center_spec] * len(phases)
    for i in top_phases:
        inputs.append(x_ph[i]); in_specs.append(top_spec)
    for i in bot_phases:
        inputs.append(x_ph[i]); in_specs.append(bot_spec)

    inputs += [w1, b1, w2, b2, w3, b3]
    in_specs += [full_spec(a) for a in (w1, b1, w2, b2, w3, b3)]
    if has_sc_conv:
        ss, bs = _fold_bn(*params["bns"], eps)
        ws = (params["ws"][:, :, 0, 0] * ss[:, None]).T.astype(jnp.bfloat16)     # (Cin, C4)
        bs = bs[None, :].astype(jnp.float32)
        inputs += [ws, bs]
        in_specs += [full_spec(ws), full_spec(bs)]

    pad_rows = tile_flat + 2 * Wo + 2 * _MARGIN
    scratch_shapes = [pltpu.VMEM((pad_rows, C), jnp.bfloat16) for _ in phases]

    kernel = _make_kernel(s=s, Wo=Wo, tile_h=tile_h, phases=phases,
                          top_phases=top_phases, bot_phases=bot_phases,
                          has_sc_conv=has_sc_conv)

    flops = 2 * B * Ho * Wo * (Cin * C + 9 * C * C + C * C4
                               + (Cin * C4 if has_sc_conv else 0))
    bytes_accessed = (B * H * W * Cin * 2 + B * Ho * Wo * C4 * 4
                      + 2 * (Cin * C + 9 * C * C + C * C4
                             + (Cin * C4 if has_sc_conv else 0)))

    out2d = pl.pallas_call(
        kernel,
        out_shape=jax.ShapeDtypeStruct((B, Ho * Wo, C4), jnp.float32),
        grid_spec=pltpu.PrefetchScalarGridSpec(
            num_scalar_prefetch=0,
            grid=(B, n_tiles),
            in_specs=in_specs,
            out_specs=pl.BlockSpec((1, tile_flat, C4), lambda b, t: (b, t, 0)),
            scratch_shapes=scratch_shapes,
        ),
        compiler_params=pltpu.CompilerParams(
            dimension_semantics=("parallel", "parallel"),
            vmem_limit_bytes=48 * 1024 * 1024,
        ),
        cost_estimate=pl.CostEstimate(flops=flops, transcendentals=0,
                                      bytes_accessed=bytes_accessed),
    )(*inputs)

    out = out2d.reshape(B, Ho, Wo, C4)
    return jnp.transpose(out, (0, 3, 1, 2))                 # back to NCHW


# ----------------------------- pure-JAX reference -----------------------------
def _ref_forward(x, params, stride=1, eps=1e-5):
    def conv(x, w, s, padding):
        return jax.lax.conv_general_dilated(
            x, w, (s, s), padding, dimension_numbers=("NCHW", "OIHW", "NCHW"))

    def bn(t, g, b, m, v):
        g, b, m, v = (a[None, :, None, None] for a in (g, b, m, v))
        return (t - m) / jnp.sqrt(v + eps) * g + b

    relu = lambda t: jnp.maximum(t, 0.0)
    out = relu(bn(conv(x, params["w1"], 1, "VALID"), *params["bn1"]))
    out = relu(bn(conv(out, params["w2"], stride, ((1, 1), (1, 1))), *params["bn2"]))
    out = bn(conv(out, params["w3"], 1, "VALID"), *params["bn3"])
    Cin, C4 = x.shape[1], params["w3"].shape[0]
    if stride != 1 or Cin != C4:
        res = bn(conv(x, params["ws"], stride, "VALID"), *params["bns"])
    else:
        res = x
    return relu(out + res)


def _init_params(key, in_channels, out_channels):
    C, Cin, C4 = out_channels, in_channels, 4 * out_channels
    ks = jax.random.split(key, 20)

    def bn_params(k, n):
        k1, k2, k3, k4 = jax.random.split(k, 4)
        gamma = jax.random.uniform(k1, (n,), jnp.float32, 0.5, 1.5)
        beta = 0.1 * jax.random.normal(k2, (n,), jnp.float32)
        mean = 0.1 * jax.random.normal(k3, (n,), jnp.float32)
        var = jax.random.uniform(k4, (n,), jnp.float32, 0.5, 1.5)
        return (gamma, beta, mean, var)

    return {
        "w1": 0.2 * jax.random.normal(ks[0], (C, Cin, 1, 1), jnp.float32),
        "bn1": bn_params(ks[1], C),
        "w2": 0.1 * jax.random.normal(ks[2], (C, C, 3, 3), jnp.float32),
        "bn2": bn_params(ks[3], C),
        "w3": 0.1 * jax.random.normal(ks[4], (C4, C, 1, 1), jnp.float32),
        "bn3": bn_params(ks[5], C4),
        "ws": 0.2 * jax.random.normal(ks[6], (C4, Cin, 1, 1), jnp.float32),
        "bns": bn_params(ks[7], C4),
    }


if __name__ == "__main__":
    root = jax.random.PRNGKey(0)

    # (Cin, out_channels, H, W, stride, max_tile_rows)
    cases = [
        (4, 4, 16, 16, 1, 64),    # projection shortcut, 4 row tiles (halo path)
        (4, 4, 16, 16, 2, 32),    # stride 2 handled in-kernel via phase decomposition
        (16, 4, 16, 16, 1, 128),  # identity shortcut (Cin == 4*out_channels)
    ]
    for idx, (Cin, oc, H, W, stride, mtr) in enumerate(cases):
        kx, kp = jax.random.split(jax.random.fold_in(root, idx))
        params = _init_params(kp, Cin, oc)
        x = jax.random.normal(kx, (2, Cin, H, W), jnp.float32)

        out = jax.block_until_ready(
            bottleneck_forward(x, params, stride=stride, max_tile_rows=mtr))
        ref = _ref_forward(x, params, stride=stride)
        np.testing.assert_allclose(np.asarray(out), np.asarray(ref),
                                   rtol=3e-2, atol=3e-2)

    print("KERNEL_OK")
</pallas_src>

<mosaic_0001>
module attributes {stable_mosaic.version = 11 : i64} {
  func.func @kernel(%arg0: i32, %arg1: i32, %arg2: memref<1x64x4xbf16, #tpu.memory_space<vmem>>, %arg3: memref<1x16x4xbf16, #tpu.memory_space<vmem>>, %arg4: memref<1x16x4xbf16, #tpu.memory_space<vmem>>, %arg5: memref<4x4xbf16, #tpu.memory_space<vmem>>, %arg6: memref<1x4xf32, #tpu.memory_space<vmem>>, %arg7: memref<3x3x4x4xbf16, #tpu.memory_space<vmem>>, %arg8: memref<1x4xf32, #tpu.memory_space<vmem>>, %arg9: memref<4x16xbf16, #tpu.memory_space<vmem>>, %arg10: memref<1x16xf32, #tpu.memory_space<vmem>>, %arg11: memref<4x16xbf16, #tpu.memory_space<vmem>>, %arg12: memref<1x16xf32, #tpu.memory_space<vmem>>, %arg13: memref<1x64x16xf32, #tpu.memory_space<vmem>>, %arg14: memref<112x4xbf16, #tpu.memory_space<vmem>>) attributes {dimension_semantics = [#tpu.dimension_semantics<parallel>, #tpu.dimension_semantics<parallel>], iteration_bounds = array<i64: 2, 4>, scalar_prefetch = 0 : i64, scratch_operands = 1 : i64, tpu.core_type = #tpu.core_type<tc>, window_params = [{transform_indices = @transform_0, window_bounds = array<i64: 1, 64, 4>}, {transform_indices = @transform_1, window_bounds = array<i64: 1, 16, 4>}, {transform_indices = @transform_2, window_bounds = array<i64: 1, 16, 4>}, {pipeline_mode = #tpu.pipeline_mode<synchronous>, transform_indices = @transform_3, window_bounds = array<i64: 4, 4>}, {pipeline_mode = #tpu.pipeline_mode<synchronous>, transform_indices = @transform_4, window_bounds = array<i64: 1, 4>}, {pipeline_mode = #tpu.pipeline_mode<synchronous>, transform_indices = @transform_5, window_bounds = array<i64: 3, 3, 4, 4>}, {pipeline_mode = #tpu.pipeline_mode<synchronous>, transform_indices = @transform_6, window_bounds = array<i64: 1, 4>}, {pipeline_mode = #tpu.pipeline_mode<synchronous>, transform_indices = @transform_7, window_bounds = array<i64: 4, 16>}, {pipeline_mode = #tpu.pipeline_mode<synchronous>, transform_indices = @transform_8, window_bounds = array<i64: 1, 16>}, {pipeline_mode = #tpu.pipeline_mode<synchronous>, transform_indices = @transform_9, window_bounds = array<i64: 4, 16>}, {pipeline_mode = #tpu.pipeline_mode<synchronous>, transform_indices = @transform_10, window_bounds = array<i64: 1, 16>}, {transform_indices = @transform_11, window_bounds = array<i64: 1, 64, 16>}]} {
    %c0 = arith.constant 0 : index
    %c0_0 = arith.constant 0 : index
    %0 = vector.load %arg5[%c0, %c0_0] : memref<4x4xbf16, #tpu.memory_space<vmem>>, vector<4x4xbf16>
    %c0_1 = arith.constant 0 : index
    %c0_2 = arith.constant 0 : index
    %1 = vector.load %arg6[%c0_1, %c0_2] : memref<1x4xf32, #tpu.memory_space<vmem>>, vector<1x4xf32>
    %c0_3 = arith.constant 0 : index
    %c0_4 = arith.constant 0 : index
    %c0_5 = arith.constant 0 : index
    %2 = vector.load %arg2[%c0_3, %c0_4, %c0_5] : memref<1x64x4xbf16, #tpu.memory_space<vmem>>, vector<1x64x4xbf16>
    %3 = vector.shape_cast %2 : vector<1x64x4xbf16> to vector<64x4xbf16>
    %cst = arith.constant dense<0.000000e+00> : vector<64x4xf32>
    %4 = tpu.matmul %3, %0, %cst {dimension_numbers = #tpu.dot_dimension_numbers<[1], [0], [0], [1], [0, 0, 1, 1], [], []>} : vector<64x4xbf16>, vector<4x4xbf16>, vector<64x4xf32> -> vector<64x4xf32>
    %5 = vector.broadcast %1 : vector<1x4xf32> to vector<64x4xf32>
    %6 = arith.addf %4, %5 : vector<64x4xf32>
    %cst_6 = arith.constant 0.000000e+00 : f32
    %7 = vector.broadcast %cst_6 : f32 to vector<64x4xf32>
    %8 = arith.maximumf %6, %7 : vector<64x4xf32>
    %9 = arith.truncf %8 : vector<64x4xf32> to vector<64x4xbf16>
    %c24 = arith.constant 24 : index
    %c0_7 = arith.constant 0 : index
    %10 = vector.load %arg14[%c24, %c0_7] : memref<112x4xbf16, #tpu.memory_space<vmem>>, vector<64x4xbf16>
    tpu.vector_store %arg14[%c24, %c0_7], %9 {strides = array<i32>} : memref<112x4xbf16, #tpu.memory_space<vmem>>, vector<64x4xbf16>,
    %c0_8 = arith.constant 0 : index
    %c0_9 = arith.constant 0 : index
    %c0_10 = arith.constant 0 : index
    %11 = vector.load %arg3[%c0_8, %c0_9, %c0_10] : memref<1x16x4xbf16, #tpu.memory_space<vmem>>, vector<1x16x4xbf16>
    %12 = vector.shape_cast %11 : vector<1x16x4xbf16> to vector<16x4xbf16>
    %cst_11 = arith.constant dense<0.000000e+00> : vector<16x4xf32>
    %13 = tpu.matmul %12, %0, %cst_11 {dimension_numbers = #tpu.dot_dimension_numbers<[1], [0], [0], [1], [0, 0, 1, 1], [], []>} : vector<16x4xbf16>, vector<4x4xbf16>, vector<16x4xf32> -> vector<16x4xf32>
    %14 = vector.broadcast %1 : vector<1x4xf32> to vector<16x4xf32>
    %15 = arith.addf %13, %14 : vector<16x4xf32>
    %cst_12 = arith.constant 0.000000e+00 : f32
    %16 = vector.broadcast %cst_12 : f32 to vector<16x4xf32>
    %17 = arith.maximumf %15, %16 : vector<16x4xf32>
    %c0_i32 = arith.constant 0 : i32
    %18 = arith.cmpi sgt, %arg1, %c0_i32 : i32
    %19 = arith.extui %18 : i1 to i32
    %20 = arith.sitofp %19 : i32 to f32
    %21 = vector.broadcast %20 : f32 to vector<16x4xf32>
    %22 = arith.mulf %17, %21 : vector<16x4xf32>
    %23 = arith.truncf %22 : vector<16x4xf32> to vector<16x4xbf16>
    %c8 = arith.constant 8 : index
    %c0_13 = arith.constant 0 : index
    %24 = vector.load %arg14[%c8, %c0_13] : memref<112x4xbf16, #tpu.memory_space<vmem>>, vector<16x4xbf16>
    tpu.vector_store %arg14[%c8, %c0_13], %23 {strides = array<i32>} : memref<112x4xbf16, #tpu.memory_space<vmem>>, vector<16x4xbf16>,
    %c0_14 = arith.constant 0 : index
    %c0_15 = arith.constant 0 : index
    %c0_16 = arith.constant 0 : index
    %25 = vector.load %arg4[%c0_14, %c0_15, %c0_16] : memref<1x16x4xbf16, #tpu.memory_space<vmem>>, vector<1x16x4xbf16>
    %26 = vector.shape_cast %25 : vector<1x16x4xbf16> to vector<16x4xbf16>
    %cst_17 = arith.constant dense<0.000000e+00> : vector<16x4xf32>
    %27 = tpu.matmul %26, %0, %cst_17 {dimension_numbers = #tpu.dot_dimension_numbers<[1], [0], [0], [1], [0, 0, 1, 1], [], []>} : vector<16x4xbf16>, vector<4x4xbf16>, vector<16x4xf32> -> vector<16x4xf32>
    %28 = vector.broadcast %1 : vector<1x4xf32> to vector<16x4xf32>
    %29 = arith.addf %27, %28 : vector<16x4xf32>
    %cst_18 = arith.constant 0.000000e+00 : f32
    %30 = vector.broadcast %cst_18 : f32 to vector<16x4xf32>
    %31 = arith.maximumf %29, %30 : vector<16x4xf32>
    %c3_i32 = arith.constant 3 : i32
    %32 = arith.cmpi slt, %arg1, %c3_i32 : i32
    %33 = arith.extui %32 : i1 to i32
    %34 = arith.sitofp %33 : i32 to f32
    %35 = vector.broadcast %34 : f32 to vector<16x4xf32>
    %36 = arith.mulf %31, %35 : vector<16x4xf32>
    %37 = arith.truncf %36 : vector<16x4xf32> to vector<16x4xbf16>
    %c88 = arith.constant 88 : index
    %c0_19 = arith.constant 0 : index
    %38 = vector.load %arg14[%c88, %c0_19] : memref<112x4xbf16, #tpu.memory_space<vmem>>, vector<16x4xbf16>
    tpu.vector_store %arg14[%c88, %c0_19], %37 {strides = array<i32>} : memref<112x4xbf16, #tpu.memory_space<vmem>>, vector<16x4xbf16>,
    %39 = tpu.iota {dimensions = array<i32: 0>} : vector<64x4xi32>
    %c16_i32 = arith.constant 16 : i32
    %c0_i32_20 = arith.constant 0 : i32
    %40 = arith.cmpi eq, %c16_i32, %c0_i32_20 : i32
    %c1_i32 = arith.constant 1 : i32
    %41 = arith.select %40, %c1_i32, %c16_i32 : i32
    %42 = vector.broadcast %41 : i32 to vector<64x4xi32>
    %43 = arith.remsi %39, %42 : vector<64x4xi32>
    %c0_i32_21 = arith.constant 0 : i32
    %44 = vector.broadcast %c0_i32_21 : i32 to vector<64x4xi32>
    %45 = arith.cmpi ne, %43, %44 : vector<64x4xi32>
    %c0_i32_22 = arith.constant 0 : i32
    %46 = vector.broadcast %c0_i32_22 : i32 to vector<64x4xi32>
    %47 = arith.cmpi slt, %43, %46 : vector<64x4xi32>
    %c0_i32_23 = arith.constant 0 : i32
    %48 = arith.cmpi slt, %41, %c0_i32_23 : i32
    %49 = vector.broadcast %48 : i1 to vector<64x4xi1>
    %50 = vector.broadcast %49 : vector<64x4xi1> to vector<64x4xi1>
    %51 = arith.xori %47, %50 : vector<64x4xi1>
    %52 = arith.andi %51, %45 : vector<64x4xi1>
    %53 = vector.broadcast %41 : i32 to vector<64x4xi32>
    %54 = arith.addi %43, %53 : vector<64x4xi32>
    %55 = arith.select %52, %54, %43 : vector<64x4xi1>, vector<64x4xi32>
    %c1_i32_24 = arith.constant 1 : i32
    %56 = vector.broadcast %c1_i32_24 : i32 to vector<64x4xi32>
    %57 = arith.cmpi sge, %55, %56 : vector<64x4xi32>
    %c14_i32 = arith.constant 14 : i32
    %58 = vector.broadcast %c14_i32 : i32 to vector<64x4xi32>
    %59 = arith.cmpi sle, %55, %58 : vector<64x4xi32>
    %c0_25 = arith.constant 0 : index
    %c0_26 = arith.constant 0 : index
    %60 = vector.load %arg8[%c0_25, %c0_26] : memref<1x4xf32, #tpu.memory_space<vmem>>, vector<1x4xf32>
    %61 = vector.shape_cast %60 : vector<1x4xf32> to vector<1x4xf32>
    %62 = vector.broadcast %61 : vector<1x4xf32> to vector<64x4xf32>
    %c7 = arith.constant 7 : index
    %c0_27 = arith.constant 0 : index
    %63 = vector.load %arg14[%c7, %c0_27] : memref<112x4xbf16, #tpu.memory_space<vmem>>, vector<64x4xbf16>
    %cst_28 = arith.constant 0.000000e+00 : bf16
    %64 = vector.broadcast %cst_28 : bf16 to vector<64x4xbf16>
    %65 = arith.select %57, %63, %64 : vector<64x4xi1>, vector<64x4xbf16>
    %c0_29 = arith.constant 0 : index
    %c0_30 = arith.constant 0 : index
    %c0_31 = arith.constant 0 : index
    %c0_32 = arith.constant 0 : index
    %66 = vector.load %arg7[%c0_29, %c0_30, %c0_31, %c0_32] : memref<3x3x4x4xbf16, #tpu.memory_space<vmem>>, vector<1x1x4x4xbf16>
    %67 = vector.shape_cast %66 : vector<1x1x4x4xbf16> to vector<4x4xbf16>
    %cst_33 = arith.constant dense<0.000000e+00> : vector<64x4xf32>
    %68 = tpu.matmul %65, %67, %cst_33 {dimension_numbers = #tpu.dot_dimension_numbers<[1], [0], [0], [1], [0, 0, 1, 1], [], []>} : vector<64x4xbf16>, vector<4x4xbf16>, vector<64x4xf32> -> vector<64x4xf32>
    %69 = arith.addf %62, %68 : vector<64x4xf32>
    %c8_34 = arith.constant 8 : index
    %c0_35 = arith.constant 0 : index
    %70 = vector.load %arg14[%c8_34, %c0_35] : memref<112x4xbf16, #tpu.memory_space<vmem>>, vector<64x4xbf16>
    %c0_36 = arith.constant 0 : index
    %c1 = arith.constant 1 : index
    %c0_37 = arith.constant 0 : index
    %c0_38 = arith.constant 0 : index
    %71 = vector.load %arg7[%c0_36, %c1, %c0_37, %c0_38] : memref<3x3x4x4xbf16, #tpu.memory_space<vmem>>, vector<1x1x4x4xbf16>
    %72 = vector.shape_cast %71 : vector<1x1x4x4xbf16> to vector<4x4xbf16>
    %cst_39 = arith.constant dense<0.000000e+00> : vector<64x4xf32>
    %73 = tpu.matmul %70, %72, %cst_39 {dimension_numbers = #tpu.dot_dimension_numbers<[1], [0], [0], [1], [0, 0, 1, 1], [], []>} : vector<64x4xbf16>, vector<4x4xbf16>, vector<64x4xf32> -> vector<64x4xf32>
    %74 = arith.addf %69, %73 : vector<64x4xf32>
    %c9 = arith.constant 9 : index
    %c0_40 = arith.constant 0 : index
    %75 = vector.load %arg14[%c9, %c0_40] : memref<112x4xbf16, #tpu.memory_space<vmem>>, vector<64x4xbf16>
    %cst_41 = arith.constant 0.000000e+00 : bf16
    %76 = vector.broadcast %cst_41 : bf16 to vector<64x4xbf16>
    %77 = arith.select %59, %75, %76 : vector<64x4xi1>, vector<64x4xbf16>
    %c0_42 = arith.constant 0 : index
    %c2 = arith.constant 2 : index
    %c0_43 = arith.constant 0 : index
    %c0_44 = arith.constant 0 : index
    %78 = vector.load %arg7[%c0_42, %c2, %c0_43, %c0_44] : memref<3x3x4x4xbf16, #tpu.memory_space<vmem>>, vector<1x1x4x4xbf16>
    %79 = vector.shape_cast %78 : vector<1x1x4x4xbf16> to vector<4x4xbf16>
    %cst_45 = arith.constant dense<0.000000e+00> : vector<64x4xf32>
    %80 = tpu.matmul %77, %79, %cst_45 {dimension_numbers = #tpu.dot_dimension_numbers<[1], [0], [0], [1], [0, 0, 1, 1], [], []>} : vector<64x4xbf16>, vector<4x4xbf16>, vector<64x4xf32> -> vector<64x4xf32>
    %81 = arith.addf %74, %80 : vector<64x4xf32>
    %c23 = arith.constant 23 : index
    %c0_46 = arith.constant 0 : index
    %82 = vector.load %arg14[%c23, %c0_46] : memref<112x4xbf16, #tpu.memory_space<vmem>>, vector<64x4xbf16>
    %cst_47 = arith.constant 0.000000e+00 : bf16
    %83 = vector.broadcast %cst_47 : bf16 to vector<64x4xbf16>
    %84 = arith.select %57, %82, %83 : vector<64x4xi1>, vector<64x4xbf16>
    %c1_48 = arith.constant 1 : index
    %c0_49 = arith.constant 0 : index
    %c0_50 = arith.constant 0 : index
    %c0_51 = arith.constant 0 : index
    %85 = vector.load %arg7[%c1_48, %c0_49, %c0_50, %c0_51] : memref<3x3x4x4xbf16, #tpu.memory_space<vmem>>, vector<1x1x4x4xbf16>
    %86 = vector.shape_cast %85 : vector<1x1x4x4xbf16> to vector<4x4xbf16>
    %cst_52 = arith.constant dense<0.000000e+00> : vector<64x4xf32>
    %87 = tpu.matmul %84, %86, %cst_52 {dimension_numbers = #tpu.dot_dimension_numbers<[1], [0], [0], [1], [0, 0, 1, 1], [], []>} : vector<64x4xbf16>, vector<4x4xbf16>, vector<64x4xf32> -> vector<64x4xf32>
    %88 = arith.addf %81, %87 : vector<64x4xf32>
    %c24_53 = arith.constant 24 : index
    %c0_54 = arith.constant 0 : index
    %89 = vector.load %arg14[%c24_53, %c0_54] : memref<112x4xbf16, #tpu.memory_space<vmem>>, vector<64x4xbf16>
    %c1_55 = arith.constant 1 : index
    %c1_56 = arith.constant 1 : index
    %c0_57 = arith.constant 0 : index
    %c0_58 = arith.constant 0 : index
    %90 = vector.load %arg7[%c1_55, %c1_56, %c0_57, %c0_58] : memref<3x3x4x4xbf16, #tpu.memory_space<vmem>>, vector<1x1x4x4xbf16>
    %91 = vector.shape_cast %90 : vector<1x1x4x4xbf16> to vector<4x4xbf16>
    %cst_59 = arith.constant dense<0.000000e+00> : vector<64x4xf32>
    %92 = tpu.matmul %89, %91, %cst_59 {dimension_numbers = #tpu.dot_dimension_numbers<[1], [0], [0], [1], [0, 0, 1, 1], [], []>} : vector<64x4xbf16>, vector<4x4xbf16>, vector<64x4xf32> -> vector<64x4xf32>
    %93 = arith.addf %88, %92 : vector<64x4xf32>
    %c25 = arith.constant 25 : index
    %c0_60 = arith.constant 0 : index
    %94 = vector.load %arg14[%c25, %c0_60] : memref<112x4xbf16, #tpu.memory_space<vmem>>, vector<64x4xbf16>
    %cst_61 = arith.constant 0.000000e+00 : bf16
    %95 = vector.broadcast %cst_61 : bf16 to vector<64x4xbf16>
    %96 = arith.select %59, %94, %95 : vector<64x4xi1>, vector<64x4xbf16>
    %c1_62 = arith.constant 1 : index
    %c2_63 = arith.constant 2 : index
    %c0_64 = arith.constant 0 : index
    %c0_65 = arith.constant 0 : index
    %97 = vector.load %arg7[%c1_62, %c2_63, %c0_64, %c0_65] : memref<3x3x4x4xbf16, #tpu.memory_space<vmem>>, vector<1x1x4x4xbf16>
    %98 = vector.shape_cast %97 : vector<1x1x4x4xbf16> to vector<4x4xbf16>
    %cst_66 = arith.constant dense<0.000000e+00> : vector<64x4xf32>
    %99 = tpu.matmul %96, %98, %cst_66 {dimension_numbers = #tpu.dot_dimension_numbers<[1], [0], [0], [1], [0, 0, 1, 1], [], []>} : vector<64x4xbf16>, vector<4x4xbf16>, vector<64x4xf32> -> vector<64x4xf32>
    %100 = arith.addf %93, %99 : vector<64x4xf32>
    %c39 = arith.constant 39 : index
    %c0_67 = arith.constant 0 : index
    %101 = vector.load %arg14[%c39, %c0_67] : memref<112x4xbf16, #tpu.memory_space<vmem>>, vector<64x4xbf16>
    %cst_68 = arith.constant 0.000000e+00 : bf16
    %102 = vector.broadcast %cst_68 : bf16 to vector<64x4xbf16>
    %103 = arith.select %57, %101, %102 : vector<64x4xi1>, vector<64x4xbf16>
    %c2_69 = arith.constant 2 : index
    %c0_70 = arith.constant 0 : index
    %c0_71 = arith.constant 0 : index
    %c0_72 = arith.constant 0 : index
    %104 = vector.load %arg7[%c2_69, %c0_70, %c0_71, %c0_72] : memref<3x3x4x4xbf16, #tpu.memory_space<vmem>>, vector<1x1x4x4xbf16>
    %105 = vector.shape_cast %104 : vector<1x1x4x4xbf16> to vector<4x4xbf16>
    %cst_73 = arith.constant dense<0.000000e+00> : vector<64x4xf32>
    %106 = tpu.matmul %103, %105, %cst_73 {dimension_numbers = #tpu.dot_dimension_numbers<[1], [0], [0], [1], [0, 0, 1, 1], [], []>} : vector<64x4xbf16>, vector<4x4xbf16>, vector<64x4xf32> -> vector<64x4xf32>
    %107 = arith.addf %100, %106 : vector<64x4xf32>
    %c40 = arith.constant 40 : index
    %c0_74 = arith.constant 0 : index
    %108 = vector.load %arg14[%c40, %c0_74] : memref<112x4xbf16, #tpu.memory_space<vmem>>, vector<64x4xbf16>
    %c2_75 = arith.constant 2 : index
    %c1_76 = arith.constant 1 : index
    %c0_77 = arith.constant 0 : index
    %c0_78 = arith.constant 0 : index
    %109 = vector.load %arg7[%c2_75, %c1_76, %c0_77, %c0_78] : memref<3x3x4x4xbf16, #tpu.memory_space<vmem>>, vector<1x1x4x4xbf16>
    %110 = vector.shape_cast %109 : vector<1x1x4x4xbf16> to vector<4x4xbf16>
    %cst_79 = arith.constant dense<0.000000e+00> : vector<64x4xf32>
    %111 = tpu.matmul %108, %110, %cst_79 {dimension_numbers = #tpu.dot_dimension_numbers<[1], [0], [0], [1], [0, 0, 1, 1], [], []>} : vector<64x4xbf16>, vector<4x4xbf16>, vector<64x4xf32> -> vector<64x4xf32>
    %112 = arith.addf %107, %111 : vector<64x4xf32>
    %c41 = arith.constant 41 : index
    %c0_80 = arith.constant 0 : index
    %113 = vector.load %arg14[%c41, %c0_80] : memref<112x4xbf16, #tpu.memory_space<vmem>>, vector<64x4xbf16>
    %cst_81 = arith.constant 0.000000e+00 : bf16
    %114 = vector.broadcast %cst_81 : bf16 to vector<64x4xbf16>
    %115 = arith.select %59, %113, %114 : vector<64x4xi1>, vector<64x4xbf16>
    %c2_82 = arith.constant 2 : index
    %c2_83 = arith.constant 2 : index
    %c0_84 = arith.constant 0 : index
    %c0_85 = arith.constant 0 : index
    %116 = vector.load %arg7[%c2_82, %c2_83, %c0_84, %c0_85] : memref<3x3x4x4xbf16, #tpu.memory_space<vmem>>, vector<1x1x4x4xbf16>
    %117 = vector.shape_cast %116 : vector<1x1x4x4xbf16> to vector<4x4xbf16>
    %cst_86 = arith.constant dense<0.000000e+00> : vector<64x4xf32>
    %118 = tpu.matmul %115, %117, %cst_86 {dimension_numbers = #tpu.dot_dimension_numbers<[1], [0], [0], [1], [0, 0, 1, 1], [], []>} : vector<64x4xbf16>, vector<4x4xbf16>, vector<64x4xf32> -> vector<64x4xf32>
    %119 = arith.addf %112, %118 : vector<64x4xf32>
    %cst_87 = arith.constant 0.000000e+00 : f32
    %120 = vector.broadcast %cst_87 : f32 to vector<64x4xf32>
    %121 = arith.maximumf %119, %120 : vector<64x4xf32>
    %122 = arith.truncf %121 : vector<64x4xf32> to vector<64x4xbf16>
    %c0_88 = arith.constant 0 : index
    %c0_89 = arith.constant 0 : index
    %123 = vector.load %arg9[%c0_88, %c0_89] : memref<4x16xbf16, #tpu.memory_space<vmem>>, vector<4x16xbf16>
    %cst_90 = arith.constant dense<0.000000e+00> : vector<64x16xf32>
    %124 = tpu.matmul %122, %123, %cst_90 {dimension_numbers = #tpu.dot_dimension_numbers<[1], [0], [0], [1], [0, 0, 1, 1], [], []>} : vector<64x4xbf16>, vector<4x16xbf16>, vector<64x16xf32> -> vector<64x16xf32>
    %c0_91 = arith.constant 0 : index
    %c0_92 = arith.constant 0 : index
    %125 = vector.load %arg10[%c0_91, %c0_92] : memref<1x16xf32, #tpu.memory_space<vmem>>, vector<1x16xf32>
    %126 = vector.broadcast %125 : vector<1x16xf32> to vector<64x16xf32>
    %127 = arith.addf %124, %126 : vector<64x16xf32>
    %c0_93 = arith.constant 0 : index
    %c0_94 = arith.constant 0 : index
    %c0_95 = arith.constant 0 : index
    %128 = vector.load %arg2[%c0_93, %c0_94, %c0_95] : memref<1x64x4xbf16, #tpu.memory_space<vmem>>, vector<1x64x4xbf16>
    %129 = vector.shape_cast %128 : vector<1x64x4xbf16> to vector<64x4xbf16>
    %c0_96 = arith.constant 0 : index
    %c0_97 = arith.constant 0 : index
    %130 = vector.load %arg11[%c0_96, %c0_97] : memref<4x16xbf16, #tpu.memory_space<vmem>>, vector<4x16xbf16>
    %cst_98 = arith.constant dense<0.000000e+00> : vector<64x16xf32>
    %131 = tpu.matmul %129, %130, %cst_98 {dimension_numbers = #tpu.dot_dimension_numbers<[1], [0], [0], [1], [0, 0, 1, 1], [], []>} : vector<64x4xbf16>, vector<4x16xbf16>, vector<64x16xf32> -> vector<64x16xf32>
    %c0_99 = arith.constant 0 : index
    %c0_100 = arith.constant 0 : index
    %132 = vector.load %arg12[%c0_99, %c0_100] : memref<1x16xf32, #tpu.memory_space<vmem>>, vector<1x16xf32>
    %133 = vector.broadcast %132 : vector<1x16xf32> to vector<64x16xf32>
    %134 = arith.addf %131, %133 : vector<64x16xf32>
    %135 = arith.addf %127, %134 : vector<64x16xf32>
    %cst_101 = arith.constant 0.000000e+00 : f32
    %136 = vector.broadcast %cst_101 : f32 to vector<64x16xf32>
    %137 = arith.maximumf %135, %136 : vector<64x16xf32>
    %c0_102 = arith.constant 0 : index
    %c0_103 = arith.constant 0 : index
    %c0_104 = arith.constant 0 : index
    %138 = vector.load %arg13[%c0_102, %c0_103, %c0_104] : memref<1x64x16xf32, #tpu.memory_space<vmem>>, vector<1x64x16xf32>
    %139 = vector.shape_cast %138 : vector<1x64x16xf32> to vector<64x16xf32>
    %140 = vector.shape_cast %137 : vector<64x16xf32> to vector<1x64x16xf32>
    tpu.vector_store %arg13[%c0_102, %c0_103, %c0_104], %140 {strides = array<i32>} : memref<1x64x16xf32, #tpu.memory_space<vmem>>, vector<1x64x16xf32>,
    return
  }
  func.func @transform_0(%arg0: i32, %arg1: i32) -> (i32, i32, i32) {
    %c0_i32 = arith.constant 0 : i32
    %c0_i32_0 = arith.constant 0 : i32
    return %arg0, %arg1, %c0_i32 : i32, i32, i32
  }
  func.func @transform_1(%arg0: i32, %arg1: i32) -> (i32, i32, i32) {
    %c4_i32 = arith.constant 4 : i32
    %0 = arith.muli %arg1, %c4_i32 : i32
    %c1_i32 = arith.constant 1 : i32
    %1 = arith.subi %0, %c1_i32 : i32
    %c0_i32 = arith.constant 0 : i32
    %2 = arith.maxsi %1, %c0_i32 : i32
    %c0_i32_0 = arith.constant 0 : i32
    %c0_i32_1 = arith.constant 0 : i32
    return %arg0, %2, %c0_i32_0 : i32, i32, i32
  }
  func.func @transform_2(%arg0: i32, %arg1: i32) -> (i32, i32, i32) {
    %c4_i32 = arith.constant 4 : i32
    %0 = arith.muli %arg1, %c4_i32 : i32
    %c4_i32_0 = arith.constant 4 : i32
    %1 = arith.addi %0, %c4_i32_0 : i32
    %c15_i32 = arith.constant 15 : i32
    %2 = arith.minsi %1, %c15_i32 : i32
    %c0_i32 = arith.constant 0 : i32
    %c0_i32_1 = arith.constant 0 : i32
    return %arg0, %2, %c0_i32 : i32, i32, i32
  }
  func.func @transform_3(%arg0: i32, %arg1: i32) -> (i32, i32) {
    %c0_i32 = arith.constant 0 : i32
    %c0_i32_0 = arith.constant 0 : i32
    %c0_i32_1 = arith.constant 0 : i32
    return %c0_i32, %c0_i32_0 : i32, i32
  }
  func.func @transform_4(%arg0: i32, %arg1: i32) -> (i32, i32) {
    %c0_i32 = arith.constant 0 : i32
    %c0_i32_0 = arith.constant 0 : i32
    %c0_i32_1 = arith.constant 0 : i32
    return %c0_i32, %c0_i32_0 : i32, i32
  }
  func.func @transform_5(%arg0: i32, %arg1: i32) -> (i32, i32, i32, i32) {
    %c0_i32 = arith.constant 0 : i32
    %c0_i32_0 = arith.constant 0 : i32
    %c0_i32_1 = arith.constant 0 : i32
    %c0_i32_2 = arith.constant 0 : i32
    %c0_i32_3 = arith.constant 0 : i32
    return %c0_i32, %c0_i32_0, %c0_i32_1, %c0_i32_2 : i32, i32, i32, i32
  }
  func.func @transform_6(%arg0: i32, %arg1: i32) -> (i32, i32) {
    %c0_i32 = arith.constant 0 : i32
    %c0_i32_0 = arith.constant 0 : i32
    %c0_i32_1 = arith.constant 0 : i32
    return %c0_i32, %c0_i32_0 : i32, i32
  }
  func.func @transform_7(%arg0: i32, %arg1: i32) -> (i32, i32) {
    %c0_i32 = arith.constant 0 : i32
    %c0_i32_0 = arith.constant 0 : i32
    %c0_i32_1 = arith.constant 0 : i32
    return %c0_i32, %c0_i32_0 : i32, i32
  }
  func.func @transform_8(%arg0: i32, %arg1: i32) -> (i32, i32) {
    %c0_i32 = arith.constant 0 : i32
    %c0_i32_0 = arith.constant 0 : i32
    %c0_i32_1 = arith.constant 0 : i32
    return %c0_i32, %c0_i32_0 : i32, i32
  }
  func.func @transform_9(%arg0: i32, %arg1: i32) -> (i32, i32) {
    %c0_i32 = arith.constant 0 : i32
    %c0_i32_0 = arith.constant 0 : i32
    %c0_i32_1 = arith.constant 0 : i32
    return %c0_i32, %c0_i32_0 : i32, i32
  }
  func.func @transform_10(%arg0: i32, %arg1: i32) -> (i32, i32) {
    %c0_i32 = arith.constant 0 : i32
    %c0_i32_0 = arith.constant 0 : i32
    %c0_i32_1 = arith.constant 0 : i32
    return %c0_i32, %c0_i32_0 : i32, i32
  }
  func.func @transform_11(%arg0: i32, %arg1: i32) -> (i32, i32, i32) {
    %c0_i32 = arith.constant 0 : i32
    %c0_i32_0 = arith.constant 0 : i32
    return %arg0, %arg1, %c0_i32 : i32, i32, i32
  }
}

</mosaic_0001>

<bundles_post_ra>
// kernel: tpu_custom_call.1
= control target key start
LH: loop header
LB: loop body
LE: loop exit
PB: predicated region body
PF: predicated region fallthrough
CT: control target
= control target key end

     0   :  { %s3213_s17 = smov 0   ;;  %s3215_s18 = smov 0   ;;  %s3826_s0 = inlined_call_operand.vmem [shape: bf16[2,256,4], index: 0, kind: input, shape index: {}]   ;;  %s3827_s1 = inlined_call_operand.vmem [shape: bf16[2,256,4], index: 1, kind: input, shape index: {}]   ;;  %s3828_s2 = inlined_call_operand.vmem [shape: bf16[2,256,4], index: 2, kind: input, shape index: {}]   ;;  %s3829_s3 = inlined_call_operand.vmem [shape: bf16[4,4], index: 3, kind: input, shape index: {}]   ;;  %s3830_s4 = inlined_call_operand.vmem [shape: f32[1,4], index: 4, kind: input, shape index: {}]   ;;  %s3831_s5 = inlined_call_operand.vmem [shape: bf16[3,3,4,4], index: 5, kind: input, shape index: {}]   ;;  %s3832_s6 = inlined_call_operand.vmem [shape: f32[1,4], index: 6, kind: input, shape index: {}]   ;;  %s3833_s7 = inlined_call_operand.vmem [shape: bf16[4,16], index: 7, kind: input, shape index: {}]   ;;  %s3834_s8 = inlined_call_operand.vmem [shape: f32[1,16], index: 8, kind: input, shape index: {}]   ;;  %s3835_s9 = inlined_call_operand.vmem [shape: bf16[4,16], index: 9, kind: input, shape index: {}]   ;;  %s3836_s10 = inlined_call_operand.vmem [shape: f32[1,16], index: 10, kind: input, shape index: {}]   ;;  %s3837_s11 = inlined_call_operand.vmem [shape: f32[2,256,16], index: 11, kind: output, shape index: {}]  }
   0x1   :  { %3838 = sst [smem:[#allocation3_spill]] %s3826_s0  ;;  %s3217_s19 = smov 0  }
   0x2   :  { %3839 = sst [smem:[#allocation4_spill]] %s3829_s3  ;;  %s3219_s20 = smov 0  }
   0x3   :  { %s3221_s21 = smov 0  }
   0x4 LB: > { %s30_s22 = sadd.s32 1, %s3139_s19  ;;  %s33_s23 = sadd.s32 1, %s3143_s20  ;;  %s3147_s21 = sphi %s3221_s21, %s21_s21   ;;  %s3143_s20 = sphi %s3219_s20, %s3859_s20   ;;  %s3139_s19 = sphi %s3217_s19, %s3858_s19   ;;  %s3135_s18 = sphi %s3215_s18, %s3857_s18   ;;  %s3131_s17 = sphi %s3213_s17, %s3856_s17  }
   0x5   : > { %p31_p0 = scmp.ge.s32.totalorder %s30_s22, 4  ;;  %p2650_p1 = scmp.ge.s32.totalorder %s3147_s21, 1 }
   0x6   : > { %p424_p2 = scmp.lt.s32.totalorder %s3147_s21, 9 }
   0x7   : > { %s3861_s22 = smov (%p31_p0, %s30_s22), 0  ;;  %s3863_s23 = smov (!%p31_p0, %s33_s23), %s3143_s20 }
   0x8   : > { %p425_p3 = pnand %p2650_p1, %p424_p2  ;;  %p35_p4 = scmp.ge.s32.totalorder %s3863_s23, 2 }
   0x9   : > { %s3840_s3 = sld [smem:[#allocation4_spill]] (!%p425_p3)  ;;  %vm606_vm0 = vcmask (!%p425_p3), 1041408   ;;  %s2651_s26 = sshll.u32 (!%p425_p3), %s3131_s17, 3  ;;  %v3149_v2 = vmov (!%p425_p3), 0.0   ;;  %vm593_vm1 = vcmask (!%p425_p3), 31744   ;;  %vm3150_vm2 = vmmov (!%p425_p3), 0  }
   0xa   : > { %s3865_s23 = smov (%p35_p4, %s3863_s23), 0  ;;  %428 = sbr.rel (%p425_p3) target bundleno = 841 (0x349), region = 64 }
   0xb   : > { %p499_p5 = scmp.lt.s32.totalorder (!%p425_p3), %s3135_s18, 1  ;;  %p501_p6 = scmp.lt.s32.totalorder (!%p425_p3), %s2651_s26, 31  ;;  %v3284_v9 = vld [vmem:[%s3831_s5 + $0x4] sm:$0x3] (!%p425_p3)  ;;  %v1048_v10 = vld [vmem:[%s3831_s5] sm:$0x3] (!%p425_p3)  ;;  %v841_v15 = vlaneseq (!%p425_p3) }
   0xc   : > { %s2654_s27 = sshll.u32 (!%p425_p3), %s3131_s17, 2  ;;  %s3841_s0 = sld [smem:[#allocation3_spill]] (!%p425_p3)  ;;  %3045 = vmatprep.subr.msk.bf16.mxu0 (!%p425_p3), %vm606_vm0, %v3284_v9  ;;  %v3294_v11 = vsel (!%p425_p3), %vm606_vm0, %v3284_v9, 0  ;;  %v1107_v12 = vsel (!%p425_p3), %vm606_vm0, %v1048_v10, 0  ;;  %v3301_v13 = vld [vmem:[%s3831_s5 + $0x6] sm:$0x3] (!%p425_p3) }
   0xd   : > { %s2655_s29 = sadd.s32 (!%p425_p3), 4294967295, %s2654_s27  ;;  %s527_s13 = sadd.s32 (!%p425_p3), 4, %s2654_s27  ;;  %2855 = vmatpush3.bf16.msra.mxu0 (!%p425_p3), %v3294_v11  ;;  %v3308_v14 = vld [vmem:[%s3831_s5 + $0x2] sm:$0x3] (!%p425_p3)  ;;  %v3312_v16 = vshrl.u32 (!%p425_p3), %v841_v15, 7  ;;  %vm3151_vm6 = vmmov (!%p425_p3), 1  }
   0xe   : > { %p510_p7 = scmp.gt.s32.totalorder (!%p425_p3), %s2655_s29, 0  ;;  %p528_p8 = scmp.lt.s32.totalorder (!%p425_p3), %s527_s13, 15  ;;  %3047 = vmatprep.subr.msk.bf16.mxu0 (!%p425_p3), %vm606_vm0, %v3301_v13  ;;  %vm975_vm7 = vmpackc.low (!%p425_p3), %vm3151_vm6, %vm3151_vm6  ;;  %v3152_v33 = vmov (!%p425_p3), 0   ;;  %v3367_v42 = vld [vmem:[%s3830_s4] ss:$0 sm:$0xff] (!%p425_p3) }
   0xf   : > { %v557_v0 = vld [vmem:[%s3840_s3] sm:$0x3] (!%p425_p3)  ;;  %v844_v17 = vadd.s32 (!%p425_p3), 16, %v3312_v16  ;;  %v854_v18 = vand.u32 (!%p425_p3), 15, %v3312_v16  ;;  %v843_v19 = vadd.s32 (!%p425_p3), 8, %v3312_v16  ;;  %v845_v20 = vadd.s32 (!%p425_p3), 24, %v3312_v16 }
  0x10   : > { %v608_v1 = vsel (!%p425_p3), %vm606_vm0, %v557_v0, 0  ;;  %3042 = vmatprep.subr.msk.bf16.mxu1 (!%p425_p3), %vm606_vm0, %v557_v0  ;;  %v846_v21 = vadd.s32 (!%p425_p3), 32, %v3312_v16  ;;  %v847_v24 = vadd.s32 (!%p425_p3), 40, %v3312_v16  ;;  %v848_v31 = vadd.s32 (!%p425_p3), 48, %v3312_v16  ;;  %p764_p11 = scmp.gt.s32.totalorder (!%p425_p3), %s3131_s17, 0  ;;  %p829_p12 = scmp.lt.s32.totalorder (!%p425_p3), %s3131_s17, 3 }
  0x11   : > { %2813 = vmatpush3.bf16.msra.mxu1 %v608_v1  ;;  %s3867_s18 = smov (!%p499_p5, %s3135_s18), 1  ;;  %s3869_s26 = smov (!%p501_p6, %s2651_s26), 31  ;;  %v868_v22 = vand.u32 15, %v844_v17  ;;  %vm3319_vm3 = vcmp.ge.s32.totalorder %v854_v18, 1  ;;  %v861_v25 = vand.u32 15, %v843_v19  ;;  %v875_v26 = vand.u32 15, %v845_v20 }
  0x12   : > { %2822 = vmatprep.subr.bf16.mxu1 %v3149_v2  ;;  %s3252_s28 = sshll.u32 %s3867_s18, 5  ;;  %s3871_s29 = smov (!%p510_p7, %s2655_s29), 0  ;;  %vm974_vm4 = vmpackc.low %vm3319_vm3, %vm3319_vm3  ;;  %v882_v27 = vand.u32 15, %v846_v21  ;;  %v889_v29 = vand.u32 15, %v847_v24  ;;  %v3345_v35 = vsel %vm975_vm7, 65537, %v3152_v33  ;;  %v896_v37 = vand.u32 15, %v848_v31 }
  0x13   : > { %s3255_s30 = sadd.s32 %s3252_s28, %s3869_s26  ;;  %s3873_s13 = smov (!%p528_p8, %s527_s13), 15  ;;  %vm3327_vm5 = vcmp.ge.s32.totalorder %v868_v22, 1  ;;  %vm3331_vm8 = vcmp.le.s32.totalorder %v861_v25, 14  ;;  %vm3336_vm9 = vcmp.le.s32.totalorder %v875_v26, 14  ;;  %v982_v34 = vsel %vm974_vm4, 65537, %v3152_v33 }
  0x14   : > { %s2653_s12 = sshll.u32 %s3255_s30, 2  ;;  %s2656_s18 = sshll.u32 %s3871_s29, 1  ;;  %vm976_vm10 = vmpackc.low %vm3327_vm5, %vm3327_vm5  ;;  %vm950_vm11 = vcmp.ge.s32.totalorder %v882_v27, 1  ;;  %vm3350_vm13 = vcmp.le.s32.totalorder %v889_v29, 14  ;;  %v2680_v39 = vcombine.low %v982_v34, %v3345_v35  ;;  %vm3371_vm3 = vcmp.ge.s32.totalorder %v896_v37, 1 }
  0x15   : > { %s3261_s16 = scalar_lea.vmem %s3841_s0, %s2653_s12  ;;  %p515_p9 = scmp.lt.s32.totalorder %s2656_s18, 31  ;;  %vm1289_vm12 = vmpackc.low %vm3331_vm8, %vm3331_vm8  ;;  %v984_v38 = vsel %vm976_vm10, 65537, %v3152_v33  ;;  %vm691_vm4 = vcmask 1043456   ;;  %vm704_vm5 = vcmask 31748   ;;  %vm1002_vm8 = vsmask.f32 3328 }
  0x16   : > { %v3099_v3 = vld [vmem:[%s3261_s16] sm:$0xff]   ;;  %v3100_v4 = vld [vmem:[%s3261_s16 + $0x8] sm:$0xff]   ;;  %v3101_v5 = vld [vmem:[%s3261_s16 + $0x10] sm:$0xff]   ;;  %s2660_s24 = sshll.u32 %s3873_s13, 1  ;;  %v1297_v40 = vsel %vm1289_vm12, 65537, %v3152_v33  ;;  %v2681_v43 = vcombine.low %v984_v38, %v3345_v35  ;;  %v1004_v46 = vshrl.u32 %v2680_v39, 16 }
  0x17   : > { %2814 = vmatprep.mubr.msk.bf16.mxu1 %vm593_vm1, %v3099_v3  ;;  %s3875_s18 = smov (!%p515_p9, %s2656_s18), 31  ;;  %p533_p10 = scmp.lt.s32.totalorder %s2660_s24, 31  ;;  %v3102_v6 = vld [vmem:[%s3261_s16 + $0x18] sm:$0xff]   ;;  %vm1291_vm14 = vmpackc.low %vm3336_vm9, %vm3336_vm9  ;;  %v1007_v47 = vshll.u32 %v2680_v39, 16  ;;  %v3376_v48 = vcombine.low %v3345_v35, %v1297_v40  ;;  %vm709_vm10 = vcmask 27648  }
  0x18   : > { %2815 = vmatmul.mubr.msk.bf16.vlgmr.msra.gmra.mrb[0].mxu1 %vm593_vm1, %v3100_v4  ;;  %s518_s25 = sadd.s32 %s3252_s28, %s3875_s18  ;;  %vm978_vm15 = vmpackc.low %vm950_vm11, %vm950_vm11  ;;  %v1299_v41 = vsel %vm1291_vm14, 65537, %v3152_v33  ;;  %v1012_v57 = vshrl.u32 %v2681_v43, 16  ;;  %v1015_v58 = vshll.u32 %v2681_v43, 16  ;;  %v3388_v62 = vrot.slane %v1004_v46, 4 }
  0x19   : > { %2823 = vmatpush3.bf16.msra.mxu1 %v608_v1  ;;  %2818 = vmatprep.mubr.msk.bf16.mxu1 %vm593_vm1, %v3101_v5  ;;  %s2658_s26 = sshll.u32 %s518_s25, 2  ;;  %s3877_s24 = smov (!%p533_p10, %s2660_s24), 31  ;;  %v986_v44 = vsel %vm978_vm15, 65537, %v3152_v33  ;;  %v2694_v51 = vcombine.low %v3345_v35, %v1299_v41  ;;  %vm980_vm6 = vmpackc.low %vm3371_vm3, %vm3371_vm3  ;;  %v3390_v63 = vrot.slane %v1007_v47, 5  ;;  %v1317_v0 = vshrl.u32 %v3376_v48, 16 }
  0x1a   : > { %2828 = vmatprep.subr.bf16.mxu1 %v3149_v2  ;;  %s520_s14 = scalar_lea.vmem %s3827_s1, %s2658_s26  ;;  %s536_s29 = sadd.s32 %s3252_s28, %s3877_s24  ;;  %v2682_v54 = vcombine.low %v986_v44, %v3345_v35  ;;  %v988_v3 = vsel %vm980_vm6, 65537, %v3152_v33  ;;  %v849_v4 = vadd.s32 56, %v3312_v16  ;;  %v1014_v19 = vrot.slane %v1012_v57, 4 }
  0x1b   : > { %s2662_s15 = sshll.u32 %s536_s29, 2  ;;  %v3103_v7 = vld [vmem:[%s520_s14] sm:$0xff]   ;;  %v1328_v15 = vshll.u32 %v2694_v51, 16  ;;  %v2683_v21 = vcombine.low %v988_v3, %v3345_v35  ;;  %v1017_v24 = vrot.slane %v1015_v58, 5  ;;  %v1320_v46 = vshll.u32 %v3376_v48, 16  ;;  %s2665_s24 = sshll.u32 %s3255_s30, 3 }
  0x1c   : > { %s538_s13 = scalar_lea.vmem %s3828_s2, %s2662_s15  ;;  %v903_v25 = vand.u32 15, %v849_v4  ;;  %vm1049_vm11 = vsmask.f32 4352  ;;  %v3433_v4 = vor.u32 %v3390_v63, %v3388_v62  ;;  %s552_s12 = scalar_lea.vmem %s3837_s11, %s2665_s24 }
  0x1d   : > { %v3104_v8 = vld [vmem:[%s538_s13] sm:$0xff]   ;;  %v1330_v36 = vrot.slane %v1328_v15, 4  ;;  %s3406_s29 = scalar_select %p764_p11, 1, 0  ;;  %v1030_v41 = vshrl.u32 %v2683_v21, 16  ;;  %v1033_v43 = vshll.u32 %v2683_v21, 16 }
  0x1e   : > { %vm3413_vm7 = vcmp.le.s32.totalorder %v903_v25, 14  ;;  %s3428_s13 = scalar_select %p829_p12, 1, 0  ;;  %vm1038_vm3 = vcmp.ne.s16.totalorder %v3433_v4, 0 }
  0x1f   : > { %s766_s15 = scvt.s32.f32 %s3406_s29  ;;  %v1032_v58 = vrot.slane %v1030_v41, 4  ;;  %vm1295_vm9 = vmpackc.low %vm3413_vm7, %vm3413_vm7 }
  0x20   : > { %2819 = vmatmul.mubr.msk.bf16.gmra.mrb[4].mxu1 %vm593_vm1, %v3102_v6  ;;  %s831_s17 = scvt.s32.f32 %s3428_s13 }
  0x21   : > { %2824 = vmatprep.mubr.msk.bf16.mxu1 %vm3150_vm2, %v3149_v2 }
  0x28   : > { %2825 = vmatmul.mubr.msk.bf16.vlgmr.msra.gmra.mrb[8].mxu1 %vm593_vm1, %v3103_v7  ;;  %v1021_v7 = vshrl.u32 %v2682_v54, 16 }
  0x29   : > { %2829 = vmatpush3.bf16.msra.mxu1 %v608_v1  ;;  %2830 = vmatprep.mubr.msk.bf16.mxu1 %vm3150_vm2, %v3149_v2  ;;  %vm1293_vm2 = vmpackc.low %vm3350_vm13, %vm3350_vm13  ;;  %v1325_v2 = vshrl.u32 %v2694_v51, 16  ;;  %v1018_v51 = vor.u32 %v1017_v24, %v1014_v19 }
  0x2a   : > { %3043 = vmatprep.subr.msk.bf16.mxu1 %vm606_vm0, %v1048_v10  ;;  %v1301_v49 = vsel %vm1293_vm2, 65537, %v3152_v33  ;;  %v1023_v29 = vrot.slane %v1021_v7, 4 }
  0x2b   : > { %v2695_v59 = vcombine.low %v3345_v35, %v1301_v49  ;;  %v1327_v16 = vrot.slane %v1325_v2, 3  ;;  %v3460_v21 = vsel %vm1002_vm8, %v3433_v4, %v1018_v51 }
  0x2c   : > { %vm1039_vm14 = vcmp.ne.s16.totalorder %v3460_v21, 0  ;;  %v2722_v21 = vld [vmem:[%s3831_s5 + $0xe] sm:$0x3] }
  0x2d   : > { %v1334_v17 = vshrl.u32 %v2695_v59, 16  ;;  %v1337_v20 = vshll.u32 %v2695_v59, 16  ;;  %v1035_v59 = vrot.slane %v1033_v43, 5 }
  0x2f   : > { %v1336_v37 = vrot.slane %v1334_v17, 3  ;;  %v1339_v40 = vrot.slane %v1337_v20, 4  ;;  %v3448_v63 = vor.u32 %v1035_v59, %v1032_v58 }
  0x30   : > { %2831 = vmatmul.mubr.msk.bf16.vlgmr.msra.gmra.mrb[12].mxu1 %vm593_vm1, %v3104_v8  ;;  %v1024_v8 = vshll.u32 %v2682_v54, 16 }
  0x31   : > { %2835 = vmatpush3.bf16.msra.mxu1 %v1107_v12  ;;  %v3421_v57 = vor.u32 %v1339_v40, %v1336_v37  ;;  %vm1042_vm15 = vcmp.ne.s16.totalorder %v3448_v63, 0 }
  0x32   : > { %3044 = vmatprep.subr.msk.bf16.mxu1 %vm606_vm0, %v3308_v14  ;;  %v1026_v30 = vrot.slane %v1024_v8, 5  ;;  %v1319_v8 = vrot.slane %v1317_v0, 3  ;;  %v767_v0 = vstv %s766_s15 }
  0xeb   : > { %v2816_v50 = vpop.f32.mrb[0].mxu1 }
  0xec   : > { %v653_v52 = vadd.f32 %v2816_v50, %v3367_v42  ;;  %v644_v53 = vpop.f32.mrb[1].mxu1 }
  0xed   : > { %v645_v55 = vadd.f32 %v3367_v42, %v644_v53  ;;  %v2817_v56 = vpop.f32.mrb[2].mxu1 }
  0xee   : > { %v656_v60 = vadd.f32 %v2817_v56, %v3367_v42  ;;  %v647_v61 = vpop.f32.mrb[3].mxu1  ;;  %v677_v5 = vmax.f32 %v653_v52, 0.0  ;;  %v1027_v52 = vor.u32 %v1026_v30, %v1023_v29 }
  0xef   : > { %v648_v1 = vadd.f32 %v3367_v42, %v647_v61  ;;  %v675_v10 = vmax.f32 %v645_v55, 0.0  ;;  %v3418_v55 = vor.u32 %v1330_v36, %v1327_v16 }
  0xf0   : > { %v678_v6 = vmax.f32 %v656_v60, 0.0  ;;  %v3469_v25 = vsel %vm1002_vm8, %v1027_v52, %v3448_v63 }
  0xf1   : > { %v676_v12 = vmax.f32 %v648_v1, 0.0  ;;  %v3446_v62 = vsel %vm1049_vm11, %v3418_v55, %v3421_v57  ;;  %vm1041_vm2 = vcmp.ne.s16.totalorder %v3469_v25, 0 }
  0xf2   : > { %v3396_v18 = vpack.c.bf16 %v678_v6, %v677_v5  ;;  %v3436_v5 = vsel %vm1002_vm8, %v1018_v51, %v1027_v52  ;;  %vm1353_vm13 = vcmp.ne.s16.totalorder %v3446_v62, 0 }
  0xf3   : > { %v683_v22 = vpack.c.bf16 %v676_v12, %v675_v10  ;;  %v2820_v23 = vpop.f32.mrb[4].mxu1  ;;  %v1322_v10 = vrot.slane %v1320_v46, 4  ;;  %v1303_v12 = vsel %vm1295_vm9, 65537, %v3152_v33  ;;  %vm1040_vm12 = vcmp.ne.s16.totalorder %v3436_v5, 0 }
  0xf4   : > { %v693_v26 = vrot.slane %v3396_v18, 4  ;;  %v669_v27 = vadd.f32 %v2820_v23, %v3367_v42  ;;  %v660_v28 = vpop.f32.mrb[5].mxu1 }
  0xf5   : > { %v692_v31 = vrot.slane %v683_v22, 4  ;;  %v661_v32 = vadd.f32 %v3367_v42, %v660_v28  ;;  %v2821_v34 = vpop.f32.mrb[6].mxu1  ;;  %v2696_v22 = vcombine.low %v3345_v35, %v1303_v12  ;;  %v3472_v28 = vor.u32 %v1322_v10, %v1319_v8 }
  0xf6   : > { %v672_v38 = vadd.f32 %v2821_v34, %v3367_v42  ;;  %v663_v39 = vpop.f32.mrb[7].mxu1  ;;  %v681_v49 = vmax.f32 %v669_v27, 0.0  ;;  %v832_v27 = vstv %s831_s17  ;;  %v3513_v12 = vsel %vm606_vm0, %v3301_v13, 0 }
  0xf7   : > { %v694_v44 = vsel %vm691_vm4, %v692_v31, %v693_v26  ;;  %705 = vst.msk [vmem:[#allocation2 + $0x8] sm:$0xf0] %vm704_vm5, %v692_v31  ;;  %v664_v45 = vadd.f32 %v3367_v42, %v663_v39  ;;  %v679_v53 = vmax.f32 %v661_v32, 0.0  ;;  %v1343_v32 = vshrl.u32 %v2696_v22, 16 }
  0xf8   : > { %706 = vst.msk [vmem:[#allocation2 + $0x10] sm:$0xff] %vm593_vm1, %v694_v44  ;;  %v682_v50 = vmax.f32 %v672_v38, 0.0  ;;  %v1346_v38 = vshll.u32 %v2696_v22, 16  ;;  %vm1351_vm6 = vcmp.ne.s16.totalorder %v3472_v28, 0 }
  0xf9   : > { %v680_v54 = vmax.f32 %v664_v45, 0.0  ;;  %v3488_v45 = vsel %vm1049_vm11, %v3472_v28, %v3418_v55 }
  0xfa   : > { %v686_v56 = vpack.c.bf16 %v682_v50, %v681_v49  ;;  %v1348_v59 = vrot.slane %v1346_v38, 4  ;;  %vm1352_vm7 = vcmp.ne.s16.totalorder %v3488_v45, 0  ;;  %v2717_v45 = vld [vmem:[%s3831_s5 + $0xc] sm:$0x3] }
  0xfb   : > { %v685_v60 = vpack.c.bf16 %v680_v54, %v679_v53  ;;  %v755_v61 = vpop.f32.mrb[8].mxu1  ;;  %v1345_v54 = vrot.slane %v1343_v32, 3 }
  0xfc   : > { %v697_v1 = vrot.slane %v686_v56, 4  ;;  %v756_v2 = vadd.f32 %v3367_v42, %v755_v61  ;;  %v2826_v3 = vpop.f32.mrb[9].mxu1 }
  0xfd   : > { %v695_v6 = vrot.slane %v685_v60, 4  ;;  %v758_v7 = vpop.f32.mrb[10].mxu1 }
  0xfe   : > { %710 = vst.msk [vmem:[#allocation2 + $0x28] sm:$0xf] %vm709_vm10, %v697_v1  ;;  %v762_v15 = vmax.f32 %v756_v2, 0.0  ;;  %v759_v17 = vadd.f32 %v3367_v42, %v758_v7  ;;  %v2827_v18 = vpop.f32.mrb[11].mxu1 }
  0xff   : > { %v696_v19 = vsel %vm691_vm4, %v693_v26, %v695_v6  ;;  %v698_v48 = vsel %vm691_vm4, %v695_v6, %v697_v1  ;;  %v3453_v33 = vld [vmem:[#allocation2 + $0x10] sm:$0xff] }
 0x100   : > { %707 = vst.msk [vmem:[#allocation2 + $0x18] sm:$0xff] %vm593_vm1, %v696_v19  ;;  %708 = vst.msk [vmem:[#allocation2 + $0x20] sm:$0xff] %vm593_vm1, %v698_v48  ;;  %v763_v20 = vmax.f32 %v759_v17, 0.0  ;;  %v768_v23 = vmul.f32 %v767_v0, %v762_v15  ;;  %v1045_v16 = vsel %vm1040_vm12, %v3453_v33, 0  ;;  %v1358_v31 = vsel %vm1353_vm13, %v3453_v33, 0 }
 0x101   : > { %v1068_v36 = vshrl.u32 %v1045_v16, 16  ;;  %v1071_v37 = vshll.u32 %v1045_v16, 16  ;;  %v1501_v43 = vsel %vm1039_vm14, %v3453_v33, 0  ;;  %v1381_v46 = vshrl.u32 %v1358_v31, 16 }
 0x102   : > { %v769_v24 = vmul.f32 %v767_v0, %v763_v20  ;;  %v1384_v47 = vshll.u32 %v1358_v31, 16  ;;  %v1516_v56 = vshrl.u32 %v1501_v43, 16  ;;  %v1519_v58 = vshll.u32 %v1501_v43, 16 }
 0x103   : > { %v820_v26 = vpop.f32.mrb[12].mxu1  ;;  %v1070_v61 = vrot.slane %v1068_v36, 3  ;;  %v1073_v3 = vrot.slane %v1071_v37, 4  ;;  %v1383_v6 = vrot.slane %v1381_v46, 4  ;;  %v3517_v15 = vsel %vm606_vm0, %v3308_v14, 0 }
 0x104   : > { %v770_v35 = vpack.c.bf16 %v769_v24, %v768_v23  ;;  %v821_v29 = vadd.f32 %v3367_v42, %v820_v26  ;;  %v2832_v30 = vpop.f32.mrb[13].mxu1  ;;  %v1386_v7 = vrot.slane %v1384_v47, 5  ;;  %v3519_v17 = vrot.slane %v1516_v56, 3 }
 0x105   : > { %v823_v34 = vpop.f32.mrb[14].mxu1  ;;  %v3521_v18 = vrot.slane %v1519_v58, 4  ;;  %v1074_v16 = vor.u32 %v1073_v3, %v1070_v61 }
 0x106   : > { %v772_v39 = vrot.slane %v770_v35, 4  ;;  %v827_v40 = vmax.f32 %v821_v29, 0.0  ;;  %v824_v41 = vadd.f32 %v3367_v42, %v823_v34  ;;  %v2833_v44 = vpop.f32.mrb[15].mxu1  ;;  %v3537_v26 = vor.u32 %v1386_v7, %v1383_v6 }
 0x107   : > { %v3491_v49 = vld [vmem:[#allocation2 + $0x18] sm:$0xff]  ;;  %v3493_v50 = vld [vmem:[#allocation2 + $0x20] sm:$0xff]  ;;  %v3539_v35 = vor.u32 %v1348_v59, %v1345_v54 }
 0x108   : > { %v3495_v42 = vld [vmem:[#allocation2 + $0x20] sm:$0xf]  ;;  %774 = vst.msk [vmem:[#allocation2] sm:$0xf0] %vm704_vm5, %v772_v39  ;;  %v833_v51 = vmul.f32 %v832_v27, %v827_v40  ;;  %v828_v52 = vmax.f32 %v824_v41, 0.0  ;;  %v3502_v53 = vsel %vm1353_vm13, %v3493_v50, 0 }
 0x109   : > { %775 = vst.msk [vmem:[#allocation2 + $0x8] sm:$0xf] %vm709_vm10, %v772_v39  ;;  %v1046_v55 = vsel %vm1041_vm2, %v3491_v49, 0  ;;  %v1047_v2 = vsel %vm1042_vm15, %v3495_v42, 0  ;;  %v3526_v48 = vsel %vm1040_vm12, %v3491_v49, 0  ;;  %v3531_v13 = vsel %vm1041_vm2, %v3493_v50, 0 }
 0x10a   : > { %v834_v60 = vmul.f32 %v832_v27, %v828_v52  ;;  %v1077_v1 = vshrl.u32 %v1046_v55, 16  ;;  %v1080_v8 = vshll.u32 %v1046_v55, 16  ;;  %v1086_v19 = vshrl.u32 %v1047_v2, 16 }
 0x10b   : > { %v1089_v22 = vshll.u32 %v1047_v2, 16  ;;  %vm1355_vm9 = vcmp.ne.s16.totalorder %v3539_v35, 0 }
 0x10c   : > { %v835_v10 = vpack.c.bf16 %v834_v60, %v833_v51  ;;  %v1079_v20 = vrot.slane %v1077_v1, 3  ;;  %v1082_v27 = vrot.slane %v1080_v8, 4 }
 0x10e   : > { %v837_v0 = vrot.slane %v835_v10, 4  ;;  %v1083_v61 = vor.u32 %v1082_v27, %v1079_v20 }
 0x10f   : > { %v969_v14 = vld [vmem:[#allocation2] sm:$0xf8] }
 0x110   : > { %v3533_v23 = vld [vmem:[#allocation2 + $0x8] sm:$0xff]  ;;  %v3535_v24 = vld [vmem:[#allocation2] sm:$0xf0]  ;;  %839 = vst.msk [vmem:[#allocation2 + $0x28] sm:$0xf0] %vm704_vm5, %v837_v0  ;;  %v1043_v29 = vsel %vm1038_vm3, %v969_v14, 0 }
 0x111   : > { %840 = vst.msk [vmem:[#allocation2 + $0x30] sm:$0xf] %vm709_vm10, %v837_v0  ;;  %v1044_v30 = vsel %vm1039_vm14, %v3533_v23, 0  ;;  %v1356_v31 = vsel %vm1351_vm6, %v3535_v24, 0  ;;  %v1357_v32 = vsel %vm1352_vm7, %v3533_v23, 0  ;;  %v1051_v34 = vshrl.u32 %v1043_v29, 16 }
 0x112   : > { %v1054_v36 = vshll.u32 %v1043_v29, 16  ;;  %v1059_v37 = vshrl.u32 %v1044_v30, 16  ;;  %v1062_v38 = vshll.u32 %v1044_v30, 16  ;;  %v1364_v39 = vshrl.u32 %v1356_v31, 16  ;;  %v1495_v44 = vld [vmem:[#allocation2 + $0x8] sm:$0xf8] }
 0x113   : > { %v1367_v40 = vshll.u32 %v1356_v31, 16  ;;  %v1372_v41 = vshrl.u32 %v1357_v32, 16  ;;  %v1375_v43 = vshll.u32 %v1357_v32, 16  ;;  %v1053_v46 = vrot.slane %v1051_v34, 3 }
 0x114   : > { %v1056_v47 = vrot.slane %v1054_v36, 4  ;;  %v1061_v51 = vrot.slane %v1059_v37, 3  ;;  %v1064_v52 = vrot.slane %v1062_v38, 4  ;;  %v1366_v54 = vrot.slane %v1364_v39, 4 }
 0x115   : > { %v1369_v55 = vrot.slane %v1367_v40, 5  ;;  %v1374_v56 = vrot.slane %v1372_v41, 4  ;;  %v1377_v58 = vrot.slane %v1375_v43, 5  ;;  %v1500_v1 = vsel %vm1038_vm3, %v1495_v44, 0 }
 0x116   : > { %v1057_v59 = vor.u32 %v1056_v47, %v1053_v46  ;;  %v1065_v60 = vor.u32 %v1064_v52, %v1061_v51  ;;  %v1508_v6 = vshrl.u32 %v1500_v1, 16  ;;  %v1511_v7 = vshll.u32 %v1500_v1, 16  ;;  %v2712_v52 = vld [vmem:[%s3831_s5 + $0xa] sm:$0x3]  ;;  %v1639_v1 = vld [vmem:[#allocation2 + $0x8] sm:$0xf0] }
 0x117   : > { %v1370_v2 = vor.u32 %v1369_v55, %v1366_v54  ;;  %v1378_v3 = vor.u32 %v1377_v58, %v1374_v56  ;;  %v1088_v0 = vrot.slane %v1086_v19, 3  ;;  %v1091_v14 = vrot.slane %v1089_v22, 4  ;;  %v2707_v19 = vld [vmem:[%s3831_s5 + $0x8] sm:$0x3] }
 0x118   : > { %v1066_v8 = vsel %vm1049_vm11, %v1057_v59, %v1065_v60  ;;  %v1075_v10 = vsel %vm1049_vm11, %v1065_v60, %v1074_v16  ;;  %v1510_v27 = vrot.slane %v1508_v6, 3  ;;  %v1513_v30 = vrot.slane %v1511_v7, 4  ;;  %v1287_v59 = vld [vmem:[#allocation2 + $0x20] sm:$0x1f] }
 0x119   : > { %2836 = vmatprep.mubr.msk.bf16.mxu1 %vm593_vm1, %v1066_v8  ;;  %v1379_v29 = vsel %vm1002_vm8, %v1370_v2, %v1378_v3  ;;  %v1388_v20 = vsel %vm1002_vm8, %v1378_v3, %v3537_v26  ;;  %v1084_v31 = vsel %vm1049_vm11, %v1074_v16, %v1083_v61  ;;  %v1525_v22 = vshrl.u32 %v3526_v48, 16 }
 0x11a   : > { %2856 = vmatprep.mubr.msk.bf16.mxu0 %vm593_vm1, %v1379_v29  ;;  %2837 = vmatmul.mubr.msk.bf16.vlgmr.msra.gmra.mrb[16].mxu1 %vm593_vm1, %v1075_v10  ;;  %v1528_v32 = vshll.u32 %v3526_v48, 16  ;;  %v1514_v34 = vor.u32 %v1513_v30, %v1510_v27  ;;  %v1522_v36 = vor.u32 %v3521_v18, %v3519_v17  ;;  %v1534_v37 = vshrl.u32 %v3531_v13, 16 }
 0x11b   : > { %2857 = vmatmul.mubr.msk.bf16.vlgmr.msra.gmra.mrb[0].mxu0 %vm593_vm1, %v1388_v20  ;;  %2840 = vmatprep.mubr.msk.bf16.mxu1 %vm593_vm1, %v1084_v31  ;;  %v1537_v16 = vshll.u32 %v3531_v13, 16  ;;  %v1092_v39 = vor.u32 %v1091_v14, %v1088_v0  ;;  %v3583_v48 = vsel %vm1049_vm11, %v3421_v57, %v3539_v35  ;;  %v1190_v17 = vrot.slane %v3535_v24, 4  ;;  %v3590_v13 = vld [vmem:[#allocation2 + $0x28] sm:$0xf] }
 0x11c   : > { %2865 = vmatpush3.bf16.msra.mxu0 %v3513_v12  ;;  %2845 = vmatpush3.bf16.msra.mxu1 %v3517_v15  ;;  %v1523_v38 = vsel %vm1049_vm11, %v1514_v34, %v1522_v36  ;;  %v1191_v12 = vrot.slane %v3533_v23, 4  ;;  %v1527_v15 = vrot.slane %v1525_v22, 3  ;;  %v1530_v18 = vrot.slane %v1528_v32, 4 }
 0x11d   : > { %3048 = vmatprep.subr.msk.bf16.mxu0 %vm606_vm0, %v2707_v19  ;;  %3046 = vmatprep.subr.msk.bf16.mxu1 %vm606_vm0, %v3284_v9  ;;  %v1536_v40 = vrot.slane %v1534_v37, 3  ;;  %v1539_v41 = vrot.slane %v1537_v16, 4  ;;  %vm1354_vm5 = vcmp.ne.s16.totalorder %v3583_v48, 0  ;;  %v1093_v57 = vsel %vm1049_vm11, %v1083_v61, %v1092_v39 }
 0x11e   : > { %2866 = vmatprep.mubr.msk.bf16.mxu0 %vm593_vm1, %v1523_v38  ;;  %v1504_v9 = vsel %vm1042_vm15, %v3590_v13, 0  ;;  %v1192_v24 = vsel %vm691_vm4, %v1190_v17, %v1191_v12  ;;  %v1531_v43 = vor.u32 %v1530_v18, %v1527_v15  ;;  %v1359_v44 = vsel %vm1354_vm5, %v3491_v49, 0  ;;  %v3634_v38 = vld [vmem:[#allocation2 + $0x10] sm:$0xf0] }
 0x11f   : > { %v1540_v23 = vor.u32 %v1539_v41, %v1536_v40  ;;  %v1543_v46 = vshrl.u32 %v1504_v9, 16  ;;  %v1546_v47 = vshll.u32 %v1504_v9, 16  ;;  %v1669_v51 = vsel %vm606_vm0, %v2707_v19, 0 }
 0x120   : > { %v1532_v54 = vsel %vm1049_vm11, %v1522_v36, %v1531_v43  ;;  %v3610_v55 = vrot.slane %v3491_v49, 4  ;;  %v1390_v56 = vshrl.u32 %v1359_v44, 16  ;;  %v1393_v58 = vshll.u32 %v1359_v44, 16 }
 0x121   : > { %v1541_v60 = vsel %vm1049_vm11, %v1531_v43, %v1540_v23  ;;  %v1193_v61 = vrot.slane %v3453_v33, 4  ;;  %v1545_v2 = vrot.slane %v1543_v46, 3  ;;  %v1548_v3 = vrot.slane %v1546_v47, 4  ;;  %v3672_v47 = vld [vmem:[#allocation2 + $0x28] sm:$0xff] }
 0x122   : > { %2841 = vmatmul.mubr.msk.bf16.gmra.mrb[20].mxu1 %vm593_vm1, %v1093_v57  ;;  %v1360_v7 = vsel %vm1355_vm9, %v1287_v59, 0  ;;  %v1745_v10 = vsel %vm1351_vm6, %v1639_v1, 0  ;;  %v1392_v0 = vrot.slane %v1390_v56, 4  ;;  %v1395_v14 = vrot.slane %v1393_v58, 5 }
 0x123   : > { %2846 = vmatprep.mubr.msk.bf16.mxu1 %vm593_vm1, %v1192_v24  ;;  %v1194_v6 = vsel %vm691_vm4, %v1191_v12, %v1193_v61  ;;  %v1196_v8 = vsel %vm691_vm4, %v1193_v61, %v3610_v55  ;;  %v1647_v29 = vrot.slane %v1639_v1, 4  ;;  %v1746_v20 = vsel %vm1352_vm7, %v3453_v33, 0 }
 0x124   : > { %v1549_v27 = vor.u32 %v1548_v3, %v1545_v2  ;;  %v1399_v30 = vshrl.u32 %v1360_v7, 16  ;;  %v1402_v31 = vshll.u32 %v1360_v7, 16  ;;  %v1197_v19 = vrot.slane %v3495_v42, 4 }
 0x125   : > { %v1753_v22 = vshrl.u32 %v1745_v10, 16  ;;  %v1756_v32 = vshll.u32 %v1745_v10, 16  ;;  %v3632_v36 = vor.u32 %v1395_v14, %v1392_v0  ;;  %v1761_v37 = vshrl.u32 %v1746_v20, 16 }
 0x126   : > { %v1550_v34 = vsel %vm1049_vm11, %v1540_v23, %v1549_v27  ;;  %v1764_v16 = vshll.u32 %v1746_v20, 16  ;;  %v3639_v33 = vrot.slane %v3493_v50, 4  ;;  %v3644_v42 = vsel %vm1353_vm13, %v3491_v49, 0 }
 0x127   : > { %2867 = vmatmul.mubr.msk.bf16.vlgmr.msra.gmra.mrb[0].mxu0 %vm593_vm1, %v1532_v54  ;;  %v1809_v39 = vsel %vm606_vm0, %v2712_v52, 0  ;;  %v1401_v17 = vrot.slane %v1399_v30, 4  ;;  %v1404_v12 = vrot.slane %v1402_v31, 5  ;;  %v1198_v15 = vsel %vm691_vm4, %v3610_v55, %v1197_v19 }
 0x128   : > { %2875 = vmatpush3.bf16.msra.mxu0 %v1669_v51  ;;  %2870 = vmatprep.mubr.msk.bf16.mxu0 %vm593_vm1, %v1541_v60  ;;  %v1755_v18 = vrot.slane %v1753_v22, 4  ;;  %v1758_v40 = vrot.slane %v1756_v32, 5  ;;  %v2134_v41 = vsel %vm1351_vm6, %v3634_v38, 0  ;;  %v1397_v62 = vsel %vm1002_vm8, %v3537_v26, %v3632_v36  ;;  %v1744_v32 = vld [vmem:[#allocation2 + $0x28] sm:$0x1f] }
 0x129   : > { %3049 = vmatprep.subr.msk.bf16.mxu0 %vm606_vm0, %v2712_v52  ;;  %v1654_v57 = vrot.slane %v3590_v13, 4  ;;  %v1763_v9 = vrot.slane %v1761_v37, 4  ;;  %v1766_v24 = vrot.slane %v1764_v16, 5  ;;  %v3662_v43 = vsel %vm691_vm4, %v3610_v55, %v3639_v33  ;;  %v2133_v52 = vld [vmem:[#allocation2 + $0x30] sm:$0x1f] }
 0x12a   : > { %2847 = vmatmul.mubr.msk.bf16.vlgmr.msra.gmra.mrb[16].mxu1 %vm593_vm1, %v1194_v6  ;;  %v1770_v28 = vshrl.u32 %v3644_v42, 16  ;;  %v2135_v23 = vsel %vm1352_vm7, %v3491_v49, 0  ;;  %v2142_v44 = vshrl.u32 %v2134_v41, 16  ;;  %v1405_v46 = vor.u32 %v1404_v12, %v1401_v17 }
 0x12b   : > { %2850 = vmatprep.mubr.msk.bf16.mxu1 %vm593_vm1, %v1196_v8  ;;  %2945 = vmatpush3.bf16.msra.mxu1 %v3294_v11  ;;  %v1649_v11 = vsel %vm691_vm4, %v1647_v29, %v1193_v61  ;;  %v1773_v26 = vshll.u32 %v3644_v42, 16  ;;  %v1748_v13 = vsel %vm1354_vm5, %v3493_v50, 0  ;;  %v2145_v51 = vshll.u32 %v2134_v41, 16 }
 0x12c   : > { %v1759_v54 = vor.u32 %v1758_v40, %v1755_v18  ;;  %v2144_v56 = vrot.slane %v2142_v44, 4  ;;  %v2150_v58 = vshrl.u32 %v2135_v23, 16  ;;  %v2153_v59 = vshll.u32 %v2135_v23, 16  ;;  %v1884_v23 = vld [vmem:[#allocation2 + $0x10] sm:$0xf8] }
 0x12d   : > { %v1767_v60 = vor.u32 %v1766_v24, %v1763_v9  ;;  %v2147_v61 = vrot.slane %v2145_v51, 5  ;;  %v2159_v1 = vshrl.u32 %v3502_v53, 16  ;;  %v2162_v2 = vshll.u32 %v3502_v53, 16 }
 0x12e   : > { %v2152_v3 = vrot.slane %v2150_v58, 4  ;;  %v2155_v6 = vrot.slane %v2153_v59, 5  ;;  %v2137_v7 = vsel %vm1354_vm5, %v3672_v47, 0  ;;  %v2138_v10 = vsel %vm1355_vm9, %v2133_v52, 0 }
 0x12f   : > { %2871 = vmatmul.mubr.msk.bf16.gmra.mrb[4].mxu0 %vm593_vm1, %v1550_v34  ;;  %v2148_v0 = vor.u32 %v2147_v61, %v2144_v56  ;;  %v2161_v14 = vrot.slane %v2159_v1, 4  ;;  %v2164_v29 = vrot.slane %v2162_v2, 5  ;;  %v2168_v20 = vshrl.u32 %v2137_v7, 16 }
 0x130   : > { %2876 = vmatprep.mubr.msk.bf16.mxu0 %vm593_vm1, %v1649_v11  ;;  %v2156_v53 = vor.u32 %v2155_v6, %v2152_v3  ;;  %v2177_v27 = vshrl.u32 %v2138_v10, 16  ;;  %v2180_v30 = vshll.u32 %v2138_v10, 16  ;;  %v1779_v31 = vshrl.u32 %v1748_v13, 16 }
 0x131   : > { %v1782_v48 = vshll.u32 %v1748_v13, 16  ;;  %v2165_v19 = vor.u32 %v2164_v29, %v2161_v14  ;;  %v2170_v22 = vrot.slane %v2168_v20, 4  ;;  %v1655_v17 = vsel %vm691_vm4, %v3639_v33, %v1654_v57 }
 0x132   : > { %2851 = vmatmul.mubr.msk.bf16.gmra.mrb[20].mxu1 %vm593_vm1, %v1198_v15  ;;  %v3689_v34 = vsel %vm1002_vm8, %v2148_v0, %v2156_v53  ;;  %v2179_v16 = vrot.slane %v2177_v27, 4  ;;  %v2182_v11 = vrot.slane %v2180_v30, 5  ;;  %v1768_v18 = vsel %vm1002_vm8, %v1759_v54, %v1767_v60 }
 0x133   : > { %2860 = vmatprep.mubr.msk.bf16.mxu1 %vm593_vm1, %v1397_v62  ;;  %v3692_v42 = vsel %vm1002_vm8, %v2156_v53, %v2165_v19  ;;  %v1772_v40 = vrot.slane %v1770_v28, 4  ;;  %v1775_v41 = vrot.slane %v1773_v26, 5  ;;  %v1749_v62 = vsel %vm1355_vm9, %v1744_v32, 0  ;;  %v1888_v53 = vld [vmem:[#allocation2 + $0x30] sm:$0xf] }
 0x134   : > { %v2183_v15 = vor.u32 %v2182_v11, %v2179_v16  ;;  %v1781_v9 = vrot.slane %v1779_v31, 4  ;;  %v1784_v24 = vrot.slane %v1782_v48, 5  ;;  %v1890_v28 = vsel %vm1039_vm14, %v3491_v49, 0 }
 0x135   : > { %v1776_v44 = vor.u32 %v1775_v41, %v1772_v40  ;;  %v1788_v35 = vshrl.u32 %v1749_v62, 16  ;;  %v1889_v26 = vsel %vm1038_vm3, %v1884_v23, 0  ;;  %v1905_v51 = vshrl.u32 %v1890_v28, 16 }
 0x136   : > { %v1785_v13 = vor.u32 %v1784_v24, %v1781_v9  ;;  %v1908_v52 = vshll.u32 %v1890_v28, 16  ;;  %v1953_v54 = vsel %vm606_vm0, %v2717_v45, 0  ;;  %v1897_v56 = vshrl.u32 %v1889_v26, 16 }
 0x137   : > { %2877 = vmatmul.mubr.msk.bf16.vlgmr.msra.gmra.mrb[0].mxu0 %vm593_vm1, %v1196_v8  ;;  %v2171_v8 = vshll.u32 %v2137_v7, 16  ;;  %v1900_v58 = vshll.u32 %v1889_v26, 16  ;;  %v1777_v59 = vsel %vm1002_vm8, %v1767_v60, %v1776_v44  ;;  %v1790_v61 = vrot.slane %v1788_v35, 4 }
 0x138   : > { %2885 = vmatpush3.bf16.msra.mxu0 %v1809_v39  ;;  %2880 = vmatprep.mubr.msk.bf16.mxu0 %vm593_vm1, %v3662_v43  ;;  %v1406_v39 = vsel %vm1002_vm8, %v3632_v36, %v1405_v46  ;;  %v1791_v46 = vshll.u32 %v1749_v62, 16  ;;  %v1786_v4 = vsel %vm1002_vm8, %v1776_v44, %v1785_v13  ;;  %v1907_v49 = vrot.slane %v1905_v51, 3 }
 0x139   : > { %3050 = vmatprep.subr.msk.bf16.mxu0 %vm606_vm0, %v2717_v45  ;;  %v2173_v37 = vrot.slane %v2171_v8, 5  ;;  %v1910_v2 = vrot.slane %v1908_v52, 4  ;;  %v1891_v45 = vsel %vm1040_vm12, %v3493_v50, 0  ;;  %v1892_v60 = vsel %vm1041_vm2, %v3672_v47, 0 }
 0x13a   : > { %v1793_v1 = vrot.slane %v1791_v46, 5  ;;  %v1899_v3 = vrot.slane %v1897_v56, 3  ;;  %v1902_v6 = vrot.slane %v1900_v58, 4  ;;  %v1914_v10 = vshrl.u32 %v1891_v45, 16  ;;  %v2679_v46 = vld [vmem:[%s3832_s6] ss:$0 sm:$0xff] }
 0x13b   : > { %v2174_v12 = vor.u32 %v2173_v37, %v2170_v22  ;;  %v1917_v0 = vshll.u32 %v1891_v45, 16  ;;  %v1911_v14 = vor.u32 %v1910_v2, %v1907_v49  ;;  %v1923_v29 = vshrl.u32 %v1892_v60, 16 }
 0x13c   : > { %v1794_v7 = vor.u32 %v1793_v1, %v1790_v61  ;;  %v1926_v20 = vshll.u32 %v1892_v60, 16  ;;  %v1903_v5 = vor.u32 %v1902_v6, %v1899_v3  ;;  %v1916_v8 = vrot.slane %v1914_v10, 3 }
 0x13d   : > { %v3704_v36 = vsel %vm1002_vm8, %v2165_v19, %v2174_v12  ;;  %v3707_v57 = vsel %vm1002_vm8, %v2174_v12, %v2183_v15  ;;  %v1919_v27 = vrot.slane %v1917_v0, 4  ;;  %v1925_v30 = vrot.slane %v1923_v29, 3  ;;  %v2727_v12 = vld [vmem:[%s3831_s5 + $0x10] sm:$0x3] }
 0x13e   : > { %2861 = vmatmul.mubr.msk.bf16.vlgmr.msra.gmra.mrb[20].mxu1 %vm593_vm1, %v1406_v39  ;;  %v1795_v50 = vsel %vm1002_vm8, %v1785_v13, %v1794_v7  ;;  %v1912_v25 = vsel %vm1049_vm11, %v1903_v5, %v1911_v14  ;;  %v1928_v31 = vrot.slane %v1926_v20, 4  ;;  %v1893_v48 = vsel %vm1042_vm15, %v1888_v53, 0 }
 0x13f   : > { %2881 = vmatmul.mubr.msk.bf16.gmra.mrb[4].mxu0 %vm593_vm1, %v1655_v17  ;;  %v1920_v19 = vor.u32 %v1919_v27, %v1916_v8  ;;  %v1932_v22 = vshrl.u32 %v1893_v48, 16  ;;  %v1935_v32 = vshll.u32 %v1893_v48, 16  ;;  %v2058_v16 = vsel %vm606_vm0, %v2722_v21, 0 }
 0x140   : > { %2886 = vmatprep.mubr.msk.bf16.mxu0 %vm593_vm1, %v1768_v18  ;;  %v1929_v37 = vor.u32 %v1928_v31, %v1925_v30  ;;  %v2036_v18 = vrot.slane %v3634_v38, 4  ;;  %v2041_v62 = vrot.slane %v3672_v47, 4  ;;  %v2198_v9 = vsel %vm606_vm0, %v2727_v12, 0 }
 0x141   : > { %v1921_v11 = vsel %vm1049_vm11, %v1911_v14, %v1920_v19  ;;  %v1934_v39 = vrot.slane %v1932_v22, 3  ;;  %v1937_v17 = vrot.slane %v1935_v32, 4  ;;  %v2043_v38 = vrot.slane %v1888_v53, 4 }
 0x142   : > { %v1930_v63 = vsel %vm1049_vm11, %v1920_v19, %v1929_v37  ;;  %v2038_v41 = vsel %vm691_vm4, %v2036_v18, %v3610_v55  ;;  %v2042_v24 = vsel %vm691_vm4, %v3639_v33, %v2041_v62  ;;  %v2285_v55 = vld [vmem:[%s3833_s7] sm:$0x3] }
 0x143   : > { %v1938_v15 = vor.u32 %v1937_v17, %v1934_v39  ;;  %v2044_v23 = vsel %vm691_vm4, %v2041_v62, %v2043_v38  ;;  %3053 = vmatprep.subr.msk.bf16.mxu1 %vm606_vm0, %v2285_v55  ;;  %v2306_v33 = vsel %vm606_vm0, %v2285_v55, 0  ;;  %v3107_v39 = vld [vmem:[%s3261_s16 + $0x10] sm:$0xff]   ;;  %v3108_v17 = vld [vmem:[%s3261_s16 + $0x18] sm:$0xff]  }
 0x144   : > { %2925 = vmatpush3.bf16.msra.mxu1 %v2306_v33 }
 0x145   : > { %v1939_v40 = vsel %vm1049_vm11, %v1929_v37, %v1938_v15 }
 0x147   : > { %2887 = vmatmul.mubr.msk.bf16.vlgmr.msra.gmra.mrb[0].mxu0 %vm593_vm1, %v1777_v59 }
 0x148   : > { %2895 = vmatpush3.bf16.msra.mxu0 %v1953_v54  ;;  %2890 = vmatprep.mubr.msk.bf16.mxu0 %vm593_vm1, %v1786_v4 }
 0x149   : > { %3051 = vmatprep.subr.msk.bf16.mxu0 %vm606_vm0, %v2722_v21 }
 0x14f   : > { %2891 = vmatmul.mubr.msk.bf16.gmra.mrb[4].mxu0 %vm593_vm1, %v1795_v50 }
 0x150   : > { %2896 = vmatprep.mubr.msk.bf16.mxu0 %vm593_vm1, %v1912_v25 }
 0x157   : > { %2897 = vmatmul.mubr.msk.bf16.vlgmr.msra.gmra.mrb[0].mxu0 %vm593_vm1, %v1921_v11  ;;  %v3106_v11 = vld [vmem:[%s3261_s16 + $0x8] sm:$0xff]  }
 0x158   : > { %2905 = vmatpush3.bf16.msra.mxu0 %v2058_v16  ;;  %2900 = vmatprep.mubr.msk.bf16.mxu0 %vm593_vm1, %v1930_v63  ;;  %v3105_v16 = vld [vmem:[%s3261_s16] sm:$0xff]  }
 0x159   : > { %3052 = vmatprep.subr.msk.bf16.mxu0 %vm606_vm0, %v2727_v12  ;;  %v2732_v12 = vld [vmem:[%s3834_s8] ss:$0 sm:$0xff] }
 0x15a   : > { %v2737_v63 = vld [vmem:[%s3836_s10] ss:$0 sm:$0xff] }
 0x15b   : > { %v2968_v15 = vadd.f32 %v2737_v63, %v2732_v12 }
 0x15f   : > { %2901 = vmatmul.mubr.msk.bf16.gmra.mrb[4].mxu0 %vm593_vm1, %v1939_v40 }
 0x160   : > { %2906 = vmatprep.mubr.msk.bf16.mxu0 %vm593_vm1, %v2038_v41 }
 0x167   : > { %2907 = vmatmul.mubr.msk.bf16.vlgmr.msra.gmra.mrb[0].mxu0 %vm593_vm1, %v3662_v43  ;;  %v2381_v43 = vld [vmem:[%s3835_s9] sm:$0x3] }
 0x168   : > { %2915 = vmatpush3.bf16.msra.mxu0 %v2198_v9  ;;  %2910 = vmatprep.mubr.msk.bf16.mxu0 %vm593_vm1, %v2042_v24  ;;  %v2422_v53 = vsel %vm606_vm0, %v2381_v43, 0 }
 0x169   : > { %3054 = vmatprep.subr.msk.bf16.mxu1 %vm606_vm0, %v2381_v43  ;;  %vm2505_vm0 = vcmask 130048  }
 0x16f   : > { %2911 = vmatmul.mubr.msk.bf16.gmra.mrb[4].mxu0 %vm593_vm1, %v2044_v23 }
 0x170   : > { %2916 = vmatprep.mubr.msk.bf16.mxu0 %vm593_vm1, %v3689_v34 }
 0x177   : > { %2917 = vmatmul.mubr.msk.bf16.vlgmr.msra.gmra.mrb[0].mxu0 %vm593_vm1, %v3692_v42 }
 0x178   : > { %2920 = vmatprep.mubr.msk.bf16.mxu0 %vm593_vm1, %v3704_v36 }
 0x17f   : > { %2921 = vmatmul.mubr.msk.bf16.gmra.mrb[4].mxu0 %vm593_vm1, %v3707_v57 }
 0x1fd   : > { %v2848_v47 = vpop.f32.mrb[16].mxu1 }
 0x1fe   : > { %v1248_v34 = vpop.f32.mrb[17].mxu1  ;;  %v2946_v26 = vadd.f32 %v2848_v47, %v2679_v46 }
 0x1ff   : > { %v2849_v42 = vpop.f32.mrb[18].mxu1  ;;  %v2948_v13 = vadd.f32 %v2679_v46, %v1248_v34 }
 0x200   : > { %v1251_v36 = vpop.f32.mrb[19].mxu1  ;;  %v2950_v52 = vadd.f32 %v2849_v42, %v2679_v46 }
 0x201   : > { %v2952_v58 = vadd.f32 %v2679_v46, %v1251_v36 }
 0x211   : > { %v2862_v57 = vpop.f32.mrb[20].mxu1 }
 0x212   : > { %v1472_v28 = vpop.f32.mrb[21].mxu1  ;;  %v2954_v3 = vadd.f32 %v2862_v57, %v2679_v46 }
 0x213   : > { %v2863_v44 = vpop.f32.mrb[22].mxu1  ;;  %v2956_v7 = vadd.f32 %v2679_v46, %v1472_v28 }
 0x214   : > { %v1475_v35 = vpop.f32.mrb[23].mxu1  ;;  %v2958_v14 = vadd.f32 %v2863_v44, %v2679_v46 }
 0x215   : > { %v2960_v5 = vadd.f32 %v2679_v46, %v1475_v35 }
 0x24a   : > { %v2918_v51 = vpop.f32.mrb[0].mxu0 }
 0x24b   : > { %v2947_v54 = vadd.f32 %v2946_v26, %v2918_v51  ;;  %v2234_v56 = vpop.f32.mrb[1].mxu0 }
 0x24c   : > { %v2949_v59 = vadd.f32 %v2948_v13, %v2234_v56  ;;  %v2919_v61 = vpop.f32.mrb[2].mxu0 }
 0x24d   : > { %v2951_v1 = vadd.f32 %v2950_v52, %v2919_v61  ;;  %v2237_v21 = vpop.f32.mrb[3].mxu0  ;;  %v2275_v49 = vmax.f32 %v2947_v54, 0.0 }
 0x24e   : > { %v2953_v4 = vadd.f32 %v2952_v58, %v2237_v21  ;;  %v2273_v45 = vmax.f32 %v2949_v59, 0.0 }
 0x24f   : > { %v2276_v2 = vmax.f32 %v2951_v1, 0.0 }
 0x250   : > { %v2274_v60 = vmax.f32 %v2953_v4, 0.0 }
 0x251   : > { %v2282_v6 = vpack.c.bf16 %v2276_v2, %v2275_v49 }
 0x252   : > { %v2281_v10 = vpack.c.bf16 %v2274_v60, %v2273_v45  ;;  %v2922_v0 = vpop.f32.mrb[4].mxu0 }
 0x253   : > { %v2955_v29 = vadd.f32 %v2954_v3, %v2922_v0  ;;  %v2250_v20 = vpop.f32.mrb[5].mxu0 }
 0x254   : > { %v2957_v50 = vadd.f32 %v2956_v7, %v2250_v20  ;;  %v2923_v8 = vpop.f32.mrb[6].mxu0  ;;  %2926 = vmatprep.mubr.msk.bf16.mxu1 %vm593_vm1, %v2281_v10 }
 0x255   : > { %v2959_v27 = vadd.f32 %v2958_v14, %v2923_v8  ;;  %v2253_v25 = vpop.f32.mrb[7].mxu0  ;;  %2927 = vmatmul.mubr.msk.bf16.vlgmr.msra.gmra.mrb[24].mxu1 %vm593_vm1, %v2282_v6  ;;  %v2279_v31 = vmax.f32 %v2955_v29, 0.0 }
 0x256   : > { %v2961_v30 = vadd.f32 %v2960_v5, %v2253_v25  ;;  %2935 = vmatpush3.bf16.msra.mxu1 %v2422_v53  ;;  %v2277_v19 = vmax.f32 %v2957_v50, 0.0 }
 0x257   : > { %v2280_v48 = vmax.f32 %v2959_v27, 0.0 }
 0x258   : > { %v2278_v22 = vmax.f32 %v2961_v30, 0.0 }
 0x259   : > { %v2284_v32 = vpack.c.bf16 %v2280_v48, %v2279_v31 }
 0x25a   : > { %v2283_v37 = vpack.c.bf16 %v2278_v22, %v2277_v19 }
 0x25c   : > { %2930 = vmatprep.mubr.msk.bf16.mxu1 %vm593_vm1, %v2283_v37 }
 0x25d   : > { %2931 = vmatmul.mubr.msk.bf16.gmra.mrb[28].mxu1 %vm593_vm1, %v2284_v32 }
 0x25e   : > { %2936 = vmatprep.mubr.msk.bf16.mxu1 %vm593_vm1, %v3105_v16 }
 0x265   : > { %2937 = vmatmul.mubr.msk.bf16.vlgmr.msra.gmra.mrb[24].mxu1 %vm593_vm1, %v3106_v11 }
 0x266   : > { %2940 = vmatprep.mubr.msk.bf16.mxu1 %vm593_vm1, %v3107_v39 }
 0x26d   : > { %2941 = vmatmul.mubr.msk.bf16.gmra.mrb[28].mxu1 %vm593_vm1, %v3108_v17 }
 0x338   : > { %v2938_v18 = vpop.f32.mrb[24].mxu1 }
 0x339   : > { %v2962_v40 = vadd.f32 %v2938_v18, %v2732_v12  ;;  %v2458_v41 = vpop.f32.mrb[25].mxu1 }
 0x33a   : > { %v2964_v62 = vadd.f32 %v2732_v12, %v2458_v41  ;;  %v2939_v9 = vpop.f32.mrb[26].mxu1 }
 0x33b   : > { %v2963_v24 = vadd.f32 %v2962_v40, %v2737_v63  ;;  %v2967_v38 = vadd.f32 %v2968_v15, %v2939_v9  ;;  %v2461_v23 = vpop.f32.mrb[27].mxu1 }
 0x33c   : > { %v2965_v55 = vadd.f32 %v2964_v62, %v2737_v63  ;;  %v2969_v33 = vadd.f32 %v2968_v15, %v2461_v23 }
 0x33d   : > { %v2499_v43 = vmax.f32 %v2963_v24, 0.0  ;;  %v2500_v47 = vmax.f32 %v2967_v38, 0.0 }
 0x33e   : > { %v2497_v34 = vmax.f32 %v2965_v55, 0.0  ;;  %v2498_v42 = vmax.f32 %v2969_v33, 0.0 }
 0x33f   : > { %2508 = vst.msk [vmem:[%s552_s12 + $0x10] sm:$0xff] %vm2505_vm0, %v2499_v43  ;;  %2509 = vst.msk [vmem:[%s552_s12 + $0x18] sm:$0xff] %vm2505_vm0, %v2500_v47 }
 0x340   : > { %2506 = vst.msk [vmem:[%s552_s12] sm:$0xff] %vm2505_vm0, %v2497_v34  ;;  %2507 = vst.msk [vmem:[%s552_s12 + $0x8] sm:$0xff] %vm2505_vm0, %v2498_v42  ;;  %v2942_v36 = vpop.f32.mrb[28].mxu1 }
 0x341   : > { %v2971_v57 = vadd.f32 %v2968_v15, %v2942_v36  ;;  %v2474_v28 = vpop.f32.mrb[29].mxu1 }
 0x342   : > { %v2973_v44 = vadd.f32 %v2968_v15, %v2474_v28  ;;  %v2943_v35 = vpop.f32.mrb[30].mxu1 }
 0x343   : > { %v2503_v46 = vmax.f32 %v2971_v57, 0.0  ;;  %v2975_v26 = vadd.f32 %v2968_v15, %v2943_v35  ;;  %v2477_v13 = vpop.f32.mrb[31].mxu1 }
 0x344   : > { %v2501_v51 = vmax.f32 %v2973_v44, 0.0  ;;  %v2977_v52 = vadd.f32 %v2968_v15, %v2477_v13 }
 0x345   : > { %2512 = vst.msk [vmem:[%s552_s12 + $0x30] sm:$0xff] %vm2505_vm0, %v2503_v46  ;;  %v2504_v54 = vmax.f32 %v2975_v26, 0.0 }
 0x346   : > { %2510 = vst.msk [vmem:[%s552_s12 + $0x20] sm:$0xff] %vm2505_vm0, %v2501_v51  ;;  %v2502_v56 = vmax.f32 %v2977_v52, 0.0 }
 0x347   : > { %2513 = vst.msk [vmem:[%s552_s12 + $0x38] sm:$0xff] %vm2505_vm0, %v2504_v54 }
 0x348   : > { %2511 = vst.msk [vmem:[%s552_s12 + $0x28] sm:$0xff] %vm2505_vm0, %v2502_v56 }
 0x349 PF: > { %s21_s21 = sadd.s32 1, %s3147_s21   ;;  %s3856_s17 = smov %s3139_s19 }
 0x34a   : > { %p18_p13 = scmp.ge.s32.totalorder %s21_s21, 10   ;;  %s3857_s18 = smov %s3143_s20 }
 0x34b   : > { %s3858_s19 = smov %s3861_s22  ;;  %s3859_s20 = smov %s3865_s23 }
 0x34c   :  { %20 = sbr.rel (!%p18_p13) target bundleno = 4 (0x4), region = 108 }

</bundles_post_ra>
